<compile_context>
chip_gen: v6e
topology: v6e:2x2x1
jax: 0.10.0
libtpu: 0.0.40
codegen_flags: <defaults>
</compile_context>

<pallas_src>
import math
import functools
import numpy as np

import jax
import jax.numpy as jnp
from jax import lax
from jax.experimental import pallas as pl
from jax.experimental.pallas import tpu as pltpu


def _fused_layers_kernel(n_heads,
                         x_ref,                       # (S, D) original input (residual)
                         wqkv_ref, bqkv_ref,          # (H, D, 3*hd), (H, 1, 3*hd)
                         wo_ref, bo_ref,              # (H, hd, D),  (1, D)
                         w1_ref, b1_ref,              # (D, 4D), (1, 4D)
                         w2_ref, b2_ref,              # (4D, D), (1, D)
                         gamma_ref, beta_ref,         # (1, D), (1, D)
                         out_ref,                     # (S, D)
                         v_scratch):                  # VMEM (S, D): running activation
    layer = pl.program_id(0)

    # Layer 0: the running activation starts as the input x.
    @pl.when(layer == 0)
    def _():
        v_scratch[...] = x_ref[...]

    x = x_ref[...]                    # (S, D)
    v_in = v_scratch[...]             # (S, D)
    S, D = x.shape
    H = n_heads
    hd = D // H

    # ---- fused QKV projection, heads batched (one batched matmul) ----------
    # 1/sqrt(hd) is already folded into the packed Q weight/bias.
    v_b = jnp.broadcast_to(v_in[None], (H, S, D))                           # (H,S,D)
    qkv = jnp.einsum('hsd,hde->hse', v_b, wqkv_ref[...],
                     preferred_element_type=jnp.float32) + bqkv_ref[...]    # (H,S,3hd)
    q = qkv[:, :, 0:hd]
    k = qkv[:, :, hd:2 * hd]
    vv = qkv[:, :, 2 * hd:3 * hd]

    # ---- batched attention over all heads ----------------------------------
    s = jnp.einsum('hqe,hke->hqk', q, k,
                   preferred_element_type=jnp.float32)                      # (H,S,S)
    s = s - jnp.max(s, axis=-1, keepdims=True)
    p = jnp.exp(s)
    p = p * pl.reciprocal(jnp.sum(p, axis=-1, keepdims=True), approx=True)
    o = jnp.einsum('hqk,hke->hqe', p, vv,
                   preferred_element_type=jnp.float32)                      # (H,S,hd)

    # ---- output projection: per-head partial products summed over heads ----
    ctx = jnp.einsum('hqe,hed->hqd', o, wo_ref[...],
                     preferred_element_type=jnp.float32)                    # (H,S,D)
    attn = jnp.sum(ctx, axis=0) + bo_ref[...]                               # (S,D)

    # ---- residual + position-wise FFN ---------------------------------------
    v1 = attn + x
    hid = jnp.maximum(
        jnp.dot(v1, w1_ref[...], preferred_element_type=jnp.float32) + b1_ref[...],
        0.0)
    v2 = jnp.dot(hid, w2_ref[...], preferred_element_type=jnp.float32) + b2_ref[...]

    # ---- LayerNorm(v2 + x) over features (eps = 1e-5, torch defaults) -------
    u = v2 + x
    mean = jnp.mean(u, axis=-1, keepdims=True)
    var = jnp.mean((u - mean) ** 2, axis=-1, keepdims=True)
    y = (u - mean) * lax.rsqrt(var + 1e-5) * gamma_ref[...] + beta_ref[...]

    # Carry the activation in VMEM; store to HBM only once, after the last layer.
    v_scratch[...] = y

    @pl.when(layer == pl.num_programs(0) - 1)
    def _():
        out_ref[...] = y


def model_forward(x2d, packed, n_heads):
    """x2d: (S, D).  packed: stacked per-layer params (see pack_params)."""
    S, D = x2d.shape
    H = n_heads
    hd = D // H
    L = packed[0].shape[0]
    kernel = functools.partial(_fused_layers_kernel, n_heads)

    out = pl.pallas_call(
        kernel,
        out_shape=jax.ShapeDtypeStruct((S, D), jnp.float32),
        grid_spec=pltpu.PrefetchScalarGridSpec(
            num_scalar_prefetch=0,
            grid=(L,),
            in_specs=[
                pl.BlockSpec((S, D), lambda l: (0, 0)),                       # x (VMEM-resident)
                pl.BlockSpec((None, H, D, 3 * hd), lambda l: (l, 0, 0, 0)),   # wqkv
                pl.BlockSpec((None, H, 1, 3 * hd), lambda l: (l, 0, 0, 0)),   # bqkv
                pl.BlockSpec((None, H, hd, D), lambda l: (l, 0, 0, 0)),       # wo (per head)
                pl.BlockSpec((None, 1, D), lambda l: (l, 0, 0)),              # bo
                pl.BlockSpec((None, D, 4 * D), lambda l: (l, 0, 0)),          # w1
                pl.BlockSpec((None, 1, 4 * D), lambda l: (l, 0, 0)),          # b1
                pl.BlockSpec((None, 4 * D, D), lambda l: (l, 0, 0)),          # w2
                pl.BlockSpec((None, 1, D), lambda l: (l, 0, 0)),              # b2
                pl.BlockSpec((None, 1, D), lambda l: (l, 0, 0)),              # gamma
                pl.BlockSpec((None, 1, D), lambda l: (l, 0, 0)),              # beta
            ],
            out_specs=pl.BlockSpec((S, D), lambda l: (0, 0)),
            scratch_shapes=[pltpu.VMEM((S, D), jnp.float32)],
        ),
        compiler_params=pltpu.CompilerParams(
            dimension_semantics=("arbitrary",)),
    )(x2d, *packed)
    # PyTorch forward views the result as (1, 1, S, D).
    return out.reshape(1, 1, S, D)


def pack_params(params, n_heads):
    """One-time packing of torch-style per-layer params into stacked,
    kernel-friendly tensors (heads split out, QKV fused, q-scale folded in)."""
    D = params[0][0].shape[0]
    H = n_heads
    hd = D // H
    scale = 1.0 / math.sqrt(hd)

    def heads_w(w, s=1.0):          # (D,D) in (in,out) layout -> (H, D, hd)
        return jnp.transpose(w.reshape(D, H, hd), (1, 0, 2)) * s

    def heads_b(b, s=1.0):          # (1,D) -> (H, 1, hd)
        return b.reshape(H, hd)[:, None, :] * s

    def pack_layer(layer):
        (wq, wk, wv, bq, bk, bv, wo, bo, w1, b1, w2, b2, gamma, beta) = layer
        wqkv = jnp.concatenate([heads_w(wq, scale), heads_w(wk), heads_w(wv)], axis=-1)
        bqkv = jnp.concatenate([heads_b(bq, scale), heads_b(bk), heads_b(bv)], axis=-1)
        wo_h = wo.reshape(H, hd, D)               # split out-proj rows per head
        return (wqkv, bqkv, wo_h, bo, w1, b1, w2, b2, gamma, beta)

    per_layer = [pack_layer(layer) for layer in params]
    n_fields = len(per_layer[0])
    return tuple(jnp.stack([lyr[i] for lyr in per_layer], axis=0)
                 for i in range(n_fields))


def reference_forward(x2d, params, n_heads):
    """Pure-JAX reference of the same math for a sanity check."""
    S, D = x2d.shape
    hd = D // n_heads
    v = x2d
    for (wq, wk, wv, bq, bk, bv, wo, bo, w1, b1, w2, b2, g, b) in params:
        q = v @ wq + bq
        k = v @ wk + bk
        vv = v @ wv + bv
        qh = q.reshape(S, n_heads, hd).transpose(1, 0, 2)
        kh = k.reshape(S, n_heads, hd).transpose(1, 0, 2)
        vh = vv.reshape(S, n_heads, hd).transpose(1, 0, 2)
        s = jnp.einsum('hqd,hkd->hqk', qh, kh) / math.sqrt(hd)
        p = jax.nn.softmax(s, axis=-1)
        o = jnp.einsum('hqk,hkd->hqd', p, vh).transpose(1, 0, 2).reshape(S, D)
        attn = o @ wo + bo
        v1 = attn + x2d
        hid = jnp.maximum(v1 @ w1 + b1, 0.0)
        v2 = hid @ w2 + b2
        u = v2 + x2d
        mean = u.mean(-1, keepdims=True)
        var = ((u - mean) ** 2).mean(-1, keepdims=True)
        v = (u - mean) / jnp.sqrt(var + 1e-5) * g + b
    return v.reshape(1, 1, S, D)


def init_params(key, dim, n_heads, n_layers):
    params = []
    for _ in range(n_layers):
        key, *ks = jax.random.split(key, 9)
        # MultiheadAttention in_proj: (3D, D) weight, (3D,) bias
        in_w = jax.random.normal(ks[0], (3 * dim, dim), jnp.float32) * (1.0 / math.sqrt(dim))
        in_b = jax.random.normal(ks[1], (3 * dim,), jnp.float32) * 0.02
        wq, wk, wv = (in_w[:dim].T, in_w[dim:2 * dim].T, in_w[2 * dim:].T)  # (D, D) (in,out)
        bq, bk, bv = (in_b[:dim].reshape(1, dim),
                      in_b[dim:2 * dim].reshape(1, dim),
                      in_b[2 * dim:].reshape(1, dim))
        # out_proj: Linear(D, D)
        wo = (jax.random.normal(ks[2], (dim, dim), jnp.float32) * (1.0 / math.sqrt(dim))).T
        bo = jax.random.normal(ks[3], (1, dim), jnp.float32) * 0.02
        # pos_ffn: Linear(D, 4D) -> ReLU -> Linear(4D, D)
        w1 = (jax.random.normal(ks[4], (4 * dim, dim), jnp.float32) * (1.0 / math.sqrt(dim))).T
        b1 = jax.random.normal(ks[5], (1, 4 * dim), jnp.float32) * 0.02
        w2 = (jax.random.normal(ks[6], (dim, 4 * dim), jnp.float32) * (1.0 / math.sqrt(4 * dim))).T
        b2 = jax.random.normal(ks[7], (1, dim), jnp.float32) * 0.02
        # LayerNorm(dim): default torch init
        gamma = jnp.ones((1, dim), jnp.float32)
        beta = jnp.zeros((1, dim), jnp.float32)
        params.append((wq, wk, wv, bq, bk, bv, wo, bo, w1, b1, w2, b2, gamma, beta))
    return params


if __name__ == "__main__":
    dim = 32        # embed dim (divisible by n_heads)
    n_heads = 16
    n_layers = 2    # >1 to exercise the fused multi-layer grid + VMEM carry
    seq = 8

    key = jax.random.PRNGKey(0)
    k_x, k_p = jax.random.split(key)
    x2d = jax.random.normal(k_x, (seq, dim), jnp.float32)   # viewed as (1,1,seq,dim)
    params = init_params(k_p, dim, n_heads, n_layers)
    packed = pack_params(params, n_heads)                   # one-time packing

    out = jax.block_until_ready(model_forward(x2d, packed, n_heads))
    ref = jax.block_until_ready(reference_forward(x2d, params, n_heads))

    assert out.shape == (1, 1, seq, dim)
    assert np.allclose(np.asarray(out), np.asarray(ref), rtol=1e-2, atol=1e-2), \
        "Pallas output does not match JAX reference"

    print("KERNEL_OK")
</pallas_src>

<mosaic_0001>
module attributes {stable_mosaic.version = 11 : i64} {
  func.func @_fused_layers_kernel(%arg0: i32, %arg1: memref<8x32xf32, #tpu.memory_space<vmem>>, %arg2: memref<1x16x32x6xf32, #tpu.memory_space<vmem>>, %arg3: memref<1x16x1x6xf32, #tpu.memory_space<vmem>>, %arg4: memref<1x16x2x32xf32, #tpu.memory_space<vmem>>, %arg5: memref<1x1x32xf32, #tpu.memory_space<vmem>>, %arg6: memref<1x32x128xf32, #tpu.memory_space<vmem>>, %arg7: memref<1x1x128xf32, #tpu.memory_space<vmem>>, %arg8: memref<1x128x32xf32, #tpu.memory_space<vmem>>, %arg9: memref<1x1x32xf32, #tpu.memory_space<vmem>>, %arg10: memref<1x1x32xf32, #tpu.memory_space<vmem>>, %arg11: memref<1x1x32xf32, #tpu.memory_space<vmem>>, %arg12: memref<8x32xf32, #tpu.memory_space<vmem>>, %arg13: memref<8x32xf32, #tpu.memory_space<vmem>>) attributes {dimension_semantics = [#tpu.dimension_semantics<arbitrary>], iteration_bounds = array<i64: 2>, scalar_prefetch = 0 : i64, scratch_operands = 1 : i64, tpu.core_type = #tpu.core_type<tc>, window_params = [{pipeline_mode = #tpu.pipeline_mode<synchronous>, transform_indices = @transform_0, window_bounds = array<i64: 8, 32>}, {transform_indices = @transform_1, window_bounds = array<i64: 1, 16, 32, 6>}, {transform_indices = @transform_2, window_bounds = array<i64: 1, 16, 1, 6>}, {transform_indices = @transform_3, window_bounds = array<i64: 1, 16, 2, 32>}, {transform_indices = @transform_4, window_bounds = array<i64: 1, 1, 32>}, {transform_indices = @transform_5, window_bounds = array<i64: 1, 32, 128>}, {transform_indices = @transform_6, window_bounds = array<i64: 1, 1, 128>}, {transform_indices = @transform_7, window_bounds = array<i64: 1, 128, 32>}, {transform_indices = @transform_8, window_bounds = array<i64: 1, 1, 32>}, {transform_indices = @transform_9, window_bounds = array<i64: 1, 1, 32>}, {transform_indices = @transform_10, window_bounds = array<i64: 1, 1, 32>}, {pipeline_mode = #tpu.pipeline_mode<synchronous>, transform_indices = @transform_11, window_bounds = array<i64: 8, 32>}]} {
    %c0_i32 = arith.constant 0 : i32
    %0 = arith.cmpi eq, %arg0, %c0_i32 : i32
    %1 = arith.extui %0 : i1 to i32
    %c0_i32_0 = arith.constant 0 : i32
    %2 = arith.cmpi ne, %1, %c0_i32_0 : i32
    scf.if %2 {
      %c0_54 = arith.constant 0 : index
      %c0_55 = arith.constant 0 : index
      %86 = vector.load %arg1[%c0_54, %c0_55] : memref<8x32xf32, #tpu.memory_space<vmem>>, vector<8x32xf32>
      %c0_56 = arith.constant 0 : index
      %c0_57 = arith.constant 0 : index
      %87 = vector.load %arg13[%c0_56, %c0_57] : memref<8x32xf32, #tpu.memory_space<vmem>>, vector<8x32xf32>
      tpu.vector_store %arg13[%c0_56, %c0_57], %86 {strides = array<i32>} : memref<8x32xf32, #tpu.memory_space<vmem>>, vector<8x32xf32>,
    } else {
    }
    %c0 = arith.constant 0 : index
    %c0_1 = arith.constant 0 : index
    %3 = vector.load %arg1[%c0, %c0_1] : memref<8x32xf32, #tpu.memory_space<vmem>>, vector<8x32xf32>
    %c0_2 = arith.constant 0 : index
    %c0_3 = arith.constant 0 : index
    %4 = vector.load %arg13[%c0_2, %c0_3] : memref<8x32xf32, #tpu.memory_space<vmem>>, vector<8x32xf32>
    %5 = vector.shape_cast %4 : vector<8x32xf32> to vector<1x8x32xf32>
    %6 = vector.shape_cast %5 : vector<1x8x32xf32> to vector<1x8x32xf32>
    %7 = vector.broadcast %6 : vector<1x8x32xf32> to vector<16x8x32xf32>
    %c0_4 = arith.constant 0 : index
    %c0_5 = arith.constant 0 : index
    %c0_6 = arith.constant 0 : index
    %c0_7 = arith.constant 0 : index
    %8 = vector.load %arg2[%c0_4, %c0_5, %c0_6, %c0_7] : memref<1x16x32x6xf32, #tpu.memory_space<vmem>>, vector<1x16x32x6xf32>
    %9 = vector.shape_cast %8 : vector<1x16x32x6xf32> to vector<16x32x6xf32>
    "tpu.trace_start"() <{level = 10 : i32, message = "hsd,hde->hse"}> : () -> ()
    %cst = arith.constant dense<0.000000e+00> : vector<16x8x6xf32>
    %10 = tpu.matmul %7, %9, %cst {dimension_numbers = #tpu.dot_dimension_numbers<[2], [1], [1], [2], [0, 0, 0, 1, 1, 2], [0], [0]>} : vector<16x8x32xf32>, vector<16x32x6xf32>, vector<16x8x6xf32> -> vector<16x8x6xf32>
    "tpu.trace_stop"() : () -> ()
    %c0_8 = arith.constant 0 : index
    %c0_9 = arith.constant 0 : index
    %c0_10 = arith.constant 0 : index
    %c0_11 = arith.constant 0 : index
    %11 = vector.load %arg3[%c0_8, %c0_9, %c0_10, %c0_11] : memref<1x16x1x6xf32, #tpu.memory_space<vmem>>, vector<1x16x1x6xf32>
    %12 = vector.shape_cast %11 : vector<1x16x1x6xf32> to vector<16x1x6xf32>
    %13 = vector.broadcast %12 : vector<16x1x6xf32> to vector<16x8x6xf32>
    %14 = arith.addf %10, %13 : vector<16x8x6xf32>
    %15 = vector.extract_strided_slice %14 {offsets = [0, 0, 0], sizes = [16, 8, 2], strides = [1, 1, 1]} : vector<16x8x6xf32> to vector<16x8x2xf32>
    %16 = vector.extract_strided_slice %14 {offsets = [0, 0, 2], sizes = [16, 8, 2], strides = [1, 1, 1]} : vector<16x8x6xf32> to vector<16x8x2xf32>
    %17 = vector.extract_strided_slice %14 {offsets = [0, 0, 4], sizes = [16, 8, 2], strides = [1, 1, 1]} : vector<16x8x6xf32> to vector<16x8x2xf32>
    "tpu.trace_start"() <{level = 10 : i32, message = "hqe,hke->hqk"}> : () -> ()
    %cst_12 = arith.constant dense<0.000000e+00> : vector<16x8x8xf32>
    %18 = tpu.matmul %15, %16, %cst_12 {dimension_numbers = #tpu.dot_dimension_numbers<[2], [2], [1], [1], [0, 0, 0, 1, 1, 1], [0], [0]>} : vector<16x8x2xf32>, vector<16x8x2xf32>, vector<16x8x8xf32> -> vector<16x8x8xf32>
    "tpu.trace_stop"() : () -> ()
    %cst_13 = arith.constant dense<0xFF800000> : vector<16x8xf32>
    %19 = vector.multi_reduction <maximumf>, %18, %cst_13 [2] : vector<16x8x8xf32> to vector<16x8xf32>
    %20 = vector.shape_cast %19 : vector<16x8xf32> to vector<16x8x1xf32>
    %21 = vector.broadcast %20 : vector<16x8x1xf32> to vector<16x8x8xf32>
    %22 = arith.subf %18, %21 : vector<16x8x8xf32>
    %23 = math.exp %22 : vector<16x8x8xf32>
    %cst_14 = arith.constant dense<0.000000e+00> : vector<16x8xf32>
    %24 = vector.multi_reduction <add>, %23, %cst_14 [2] : vector<16x8x8xf32> to vector<16x8xf32>
    %25 = vector.shape_cast %24 : vector<16x8xf32> to vector<16x8x1xf32>
    %26 = tpu.reciprocal %25 {approx = true} : vector<16x8x1xf32> -> vector<16x8x1xf32>
    %27 = vector.broadcast %26 : vector<16x8x1xf32> to vector<16x8x8xf32>
    %28 = arith.mulf %23, %27 : vector<16x8x8xf32>
    "tpu.trace_start"() <{level = 10 : i32, message = "hqk,hke->hqe"}> : () -> ()
    %cst_15 = arith.constant dense<0.000000e+00> : vector<16x8x2xf32>
    %29 = tpu.matmul %28, %17, %cst_15 {dimension_numbers = #tpu.dot_dimension_numbers<[2], [1], [1], [2], [0, 0, 0, 1, 1, 2], [0], [0]>} : vector<16x8x8xf32>, vector<16x8x2xf32>, vector<16x8x2xf32> -> vector<16x8x2xf32>
    "tpu.trace_stop"() : () -> ()
    %c0_16 = arith.constant 0 : index
    %c0_17 = arith.constant 0 : index
    %c0_18 = arith.constant 0 : index
    %c0_19 = arith.constant 0 : index
    %30 = vector.load %arg4[%c0_16, %c0_17, %c0_18, %c0_19] : memref<1x16x2x32xf32, #tpu.memory_space<vmem>>, vector<1x16x2x32xf32>
    %31 = vector.shape_cast %30 : vector<1x16x2x32xf32> to vector<16x2x32xf32>
    "tpu.trace_start"() <{level = 10 : i32, message = "hqe,hed->hqd"}> : () -> ()
    %cst_20 = arith.constant dense<0.000000e+00> : vector<16x8x32xf32>
    %32 = tpu.matmul %29, %31, %cst_20 {dimension_numbers = #tpu.dot_dimension_numbers<[2], [1], [1], [2], [0, 0, 0, 1, 1, 2], [0], [0]>} : vector<16x8x2xf32>, vector<16x2x32xf32>, vector<16x8x32xf32> -> vector<16x8x32xf32>
    "tpu.trace_stop"() : () -> ()
    %cst_21 = arith.constant dense<0.000000e+00> : vector<8x32xf32>
    %33 = vector.multi_reduction <add>, %32, %cst_21 [0] : vector<16x8x32xf32> to vector<8x32xf32>
    %c0_22 = arith.constant 0 : index
    %c0_23 = arith.constant 0 : index
    %c0_24 = arith.constant 0 : index
    %34 = vector.load %arg5[%c0_22, %c0_23, %c0_24] : memref<1x1x32xf32, #tpu.memory_space<vmem>>, vector<1x1x32xf32>
    %35 = vector.shape_cast %34 : vector<1x1x32xf32> to vector<1x32xf32>
    %36 = vector.broadcast %35 : vector<1x32xf32> to vector<8x32xf32>
    %37 = arith.addf %33, %36 : vector<8x32xf32>
    %38 = arith.addf %37, %3 : vector<8x32xf32>
    %c0_25 = arith.constant 0 : index
    %c0_26 = arith.constant 0 : index
    %c0_27 = arith.constant 0 : index
    %39 = vector.load %arg6[%c0_25, %c0_26, %c0_27] : memref<1x32x128xf32, #tpu.memory_space<vmem>>, vector<1x32x128xf32>
    %40 = vector.shape_cast %39 : vector<1x32x128xf32> to vector<32x128xf32>
    %cst_28 = arith.constant dense<0.000000e+00> : vector<8x128xf32>
    %41 = tpu.matmul %38, %40, %cst_28 {dimension_numbers = #tpu.dot_dimension_numbers<[1], [0], [0], [1], [0, 0, 1, 1], [], []>} : vector<8x32xf32>, vector<32x128xf32>, vector<8x128xf32> -> vector<8x128xf32>
    %c0_29 = arith.constant 0 : index
    %c0_30 = arith.constant 0 : index
    %c0_31 = arith.constant 0 : index
    %42 = vector.load %arg7[%c0_29, %c0_30, %c0_31] : memref<1x1x128xf32, #tpu.memory_space<vmem>>, vector<1x1x128xf32>
    %43 = vector.shape_cast %42 : vector<1x1x128xf32> to vector<1x128xf32>
    %44 = vector.broadcast %43 : vector<1x128xf32> to vector<8x128xf32>
    %45 = arith.addf %41, %44 : vector<8x128xf32>
    %cst_32 = arith.constant 0.000000e+00 : f32
    %46 = vector.broadcast %cst_32 : f32 to vector<8x128xf32>
    %47 = arith.maximumf %45, %46 : vector<8x128xf32>
    %c0_33 = arith.constant 0 : index
    %c0_34 = arith.constant 0 : index
    %c0_35 = arith.constant 0 : index
    %48 = vector.load %arg8[%c0_33, %c0_34, %c0_35] : memref<1x128x32xf32, #tpu.memory_space<vmem>>, vector<1x128x32xf32>
    %49 = vector.shape_cast %48 : vector<1x128x32xf32> to vector<128x32xf32>
    %cst_36 = arith.constant dense<0.000000e+00> : vector<8x32xf32>
    %50 = tpu.matmul %47, %49, %cst_36 {dimension_numbers = #tpu.dot_dimension_numbers<[1], [0], [0], [1], [0, 0, 1, 1], [], []>} : vector<8x128xf32>, vector<128x32xf32>, vector<8x32xf32> -> vector<8x32xf32>
    %c0_37 = arith.constant 0 : index
    %c0_38 = arith.constant 0 : index
    %c0_39 = arith.constant 0 : index
    %51 = vector.load %arg9[%c0_37, %c0_38, %c0_39] : memref<1x1x32xf32, #tpu.memory_space<vmem>>, vector<1x1x32xf32>
    %52 = vector.shape_cast %51 : vector<1x1x32xf32> to vector<1x32xf32>
    %53 = vector.broadcast %52 : vector<1x32xf32> to vector<8x32xf32>
    %54 = arith.addf %50, %53 : vector<8x32xf32>
    %55 = arith.addf %54, %3 : vector<8x32xf32>
    %cst_40 = arith.constant dense<0.000000e+00> : vector<8xf32>
    %56 = vector.multi_reduction <add>, %55, %cst_40 [1] : vector<8x32xf32> to vector<8xf32>
    %57 = vector.shape_cast %56 : vector<8xf32> to vector<8x1xf32>
    %cst_41 = arith.constant 3.200000e+01 : f32
    %58 = vector.broadcast %cst_41 : f32 to vector<8x1xf32>
    %59 = arith.divf %57, %58 : vector<8x1xf32>
    %60 = vector.broadcast %59 : vector<8x1xf32> to vector<8x32xf32>
    %61 = arith.subf %55, %60 : vector<8x32xf32>
    %62 = arith.mulf %61, %61 : vector<8x32xf32>
    %cst_42 = arith.constant dense<0.000000e+00> : vector<8xf32>
    %63 = vector.multi_reduction <add>, %62, %cst_42 [1] : vector<8x32xf32> to vector<8xf32>
    %64 = vector.shape_cast %63 : vector<8xf32> to vector<8x1xf32>
    %cst_43 = arith.constant 3.200000e+01 : f32
    %65 = vector.broadcast %cst_43 : f32 to vector<8x1xf32>
    %66 = arith.divf %64, %65 : vector<8x1xf32>
    %67 = vector.broadcast %59 : vector<8x1xf32> to vector<8x32xf32>
    %68 = arith.subf %55, %67 : vector<8x32xf32>
    %cst_44 = arith.constant 9.99999974E-6 : f32
    %69 = vector.broadcast %cst_44 : f32 to vector<8x1xf32>
    %70 = arith.addf %66, %69 : vector<8x1xf32>
    %71 = math.rsqrt %70 : vector<8x1xf32>
    %72 = vector.broadcast %71 : vector<8x1xf32> to vector<8x32xf32>
    %73 = arith.mulf %68, %72 : vector<8x32xf32>
    %c0_45 = arith.constant 0 : index
    %c0_46 = arith.constant 0 : index
    %c0_47 = arith.constant 0 : index
    %74 = vector.load %arg10[%c0_45, %c0_46, %c0_47] : memref<1x1x32xf32, #tpu.memory_space<vmem>>, vector<1x1x32xf32>
    %75 = vector.shape_cast %74 : vector<1x1x32xf32> to vector<1x32xf32>
    %76 = vector.broadcast %75 : vector<1x32xf32> to vector<8x32xf32>
    %77 = arith.mulf %73, %76 : vector<8x32xf32>
    %c0_48 = arith.constant 0 : index
    %c0_49 = arith.constant 0 : index
    %c0_50 = arith.constant 0 : index
    %78 = vector.load %arg11[%c0_48, %c0_49, %c0_50] : memref<1x1x32xf32, #tpu.memory_space<vmem>>, vector<1x1x32xf32>
    %79 = vector.shape_cast %78 : vector<1x1x32xf32> to vector<1x32xf32>
    %80 = vector.broadcast %79 : vector<1x32xf32> to vector<8x32xf32>
    %81 = arith.addf %77, %80 : vector<8x32xf32>
    %c0_51 = arith.constant 0 : index
    %c0_52 = arith.constant 0 : index
    %82 = vector.load %arg13[%c0_51, %c0_52] : memref<8x32xf32, #tpu.memory_space<vmem>>, vector<8x32xf32>
    tpu.vector_store %arg13[%c0_51, %c0_52], %81 {strides = array<i32>} : memref<8x32xf32, #tpu.memory_space<vmem>>, vector<8x32xf32>,
    %c1_i32 = arith.constant 1 : i32
    %83 = arith.cmpi eq, %arg0, %c1_i32 : i32
    %84 = arith.extui %83 : i1 to i32
    %c0_i32_53 = arith.constant 0 : i32
    %85 = arith.cmpi ne, %84, %c0_i32_53 : i32
    scf.if %85 {
      %c0_54 = arith.constant 0 : index
      %c0_55 = arith.constant 0 : index
      %86 = vector.load %arg12[%c0_54, %c0_55] : memref<8x32xf32, #tpu.memory_space<vmem>>, vector<8x32xf32>
      tpu.vector_store %arg12[%c0_54, %c0_55], %81 {strides = array<i32>} : memref<8x32xf32, #tpu.memory_space<vmem>>, vector<8x32xf32>,
    } else {
    }
    return
  }
  func.func @transform_0(%arg0: i32) -> (i32, i32) {
    %c0_i32 = arith.constant 0 : i32
    %c0_i32_0 = arith.constant 0 : i32
    %c0_i32_1 = arith.constant 0 : i32
    return %c0_i32, %c0_i32_0 : i32, i32
  }
  func.func @transform_1(%arg0: i32) -> (i32, i32, i32, i32) {
    %c0_i32 = arith.constant 0 : i32
    %c0_i32_0 = arith.constant 0 : i32
    %c0_i32_1 = arith.constant 0 : i32
    %c0_i32_2 = arith.constant 0 : i32
    return %arg0, %c0_i32, %c0_i32_0, %c0_i32_1 : i32, i32, i32, i32
  }
  func.func @transform_2(%arg0: i32) -> (i32, i32, i32, i32) {
    %c0_i32 = arith.constant 0 : i32
    %c0_i32_0 = arith.constant 0 : i32
    %c0_i32_1 = arith.constant 0 : i32
    %c0_i32_2 = arith.constant 0 : i32
    return %arg0, %c0_i32, %c0_i32_0, %c0_i32_1 : i32, i32, i32, i32
  }
  func.func @transform_3(%arg0: i32) -> (i32, i32, i32, i32) {
    %c0_i32 = arith.constant 0 : i32
    %c0_i32_0 = arith.constant 0 : i32
    %c0_i32_1 = arith.constant 0 : i32
    %c0_i32_2 = arith.constant 0 : i32
    return %arg0, %c0_i32, %c0_i32_0, %c0_i32_1 : i32, i32, i32, i32
  }
  func.func @transform_4(%arg0: i32) -> (i32, i32, i32) {
    %c0_i32 = arith.constant 0 : i32
    %c0_i32_0 = arith.constant 0 : i32
    %c0_i32_1 = arith.constant 0 : i32
    return %arg0, %c0_i32, %c0_i32_0 : i32, i32, i32
  }
  func.func @transform_5(%arg0: i32) -> (i32, i32, i32) {
    %c0_i32 = arith.constant 0 : i32
    %c0_i32_0 = arith.constant 0 : i32
    %c0_i32_1 = arith.constant 0 : i32
    return %arg0, %c0_i32, %c0_i32_0 : i32, i32, i32
  }
  func.func @transform_6(%arg0: i32) -> (i32, i32, i32) {
    %c0_i32 = arith.constant 0 : i32
    %c0_i32_0 = arith.constant 0 : i32
    %c0_i32_1 = arith.constant 0 : i32
    return %arg0, %c0_i32, %c0_i32_0 : i32, i32, i32
  }
  func.func @transform_7(%arg0: i32) -> (i32, i32, i32) {
    %c0_i32 = arith.constant 0 : i32
    %c0_i32_0 = arith.constant 0 : i32
    %c0_i32_1 = arith.constant 0 : i32
    return %arg0, %c0_i32, %c0_i32_0 : i32, i32, i32
  }
  func.func @transform_8(%arg0: i32) -> (i32, i32, i32) {
    %c0_i32 = arith.constant 0 : i32
    %c0_i32_0 = arith.constant 0 : i32
    %c0_i32_1 = arith.constant 0 : i32
    return %arg0, %c0_i32, %c0_i32_0 : i32, i32, i32
  }
  func.func @transform_9(%arg0: i32) -> (i32, i32, i32) {
    %c0_i32 = arith.constant 0 : i32
    %c0_i32_0 = arith.constant 0 : i32
    %c0_i32_1 = arith.constant 0 : i32
    return %arg0, %c0_i32, %c0_i32_0 : i32, i32, i32
  }
  func.func @transform_10(%arg0: i32) -> (i32, i32, i32) {
    %c0_i32 = arith.constant 0 : i32
    %c0_i32_0 = arith.constant 0 : i32
    %c0_i32_1 = arith.constant 0 : i32
    return %arg0, %c0_i32, %c0_i32_0 : i32, i32, i32
  }
  func.func @transform_11(%arg0: i32) -> (i32, i32) {
    %c0_i32 = arith.constant 0 : i32
    %c0_i32_0 = arith.constant 0 : i32
    %c0_i32_1 = arith.constant 0 : i32
    return %c0_i32, %c0_i32_0 : i32, i32
  }
}

</mosaic_0001>

<bundles_post_ra>
// kernel: tpu_custom_call.1
= control target key start
LH: loop header
LB: loop body
LE: loop exit
PB: predicated region body
PF: predicated region fallthrough
CT: control target
= control target key end

     0   :  { %s8003_s0 = inlined_call_operand.vmem [shape: f32[8,32], index: 0, kind: input, shape index: {}]   ;;  %s8004_s1 = inlined_call_operand.vmem [shape: f32[2,16,32,6], index: 1, kind: input, shape index: {}]   ;;  %s8005_s2 = inlined_call_operand.vmem [shape: f32[2,16,1,6], index: 2, kind: input, shape index: {}]   ;;  %s8006_s3 = inlined_call_operand.vmem [shape: f32[2,16,2,32], index: 3, kind: input, shape index: {}]   ;;  %s8007_s4 = inlined_call_operand.vmem [shape: f32[2,1,32], index: 4, kind: input, shape index: {}]   ;;  %s8008_s5 = inlined_call_operand.vmem [shape: f32[2,32,128], index: 5, kind: input, shape index: {}]   ;;  %s8009_s6 = inlined_call_operand.vmem [shape: f32[2,1,128], index: 6, kind: input, shape index: {}]   ;;  %s8010_s7 = inlined_call_operand.vmem [shape: f32[2,128,32], index: 7, kind: input, shape index: {}]   ;;  %s8011_s8 = inlined_call_operand.vmem [shape: f32[2,1,32], index: 8, kind: input, shape index: {}]   ;;  %s8012_s9 = inlined_call_operand.vmem [shape: f32[2,1,32], index: 9, kind: input, shape index: {}]   ;;  %s8013_s10 = inlined_call_operand.vmem [shape: f32[2,1,32], index: 10, kind: input, shape index: {}]   ;;  %s8014_s11 = inlined_call_operand.hbm [shape: f32[8,32], index: 11, kind: output, shape index: {}]  }
   0x1   :  { %8016 = sst [smem:[#allocation7_spill]] %s8004_s1 }
   0x2   :  { %8017 = sst [smem:[#allocation8_spill]] %s8005_s2 }
   0x3   :  { %8018 = sst [smem:[#allocation9_spill]] %s8006_s3 }
   0x4   :  { %16 = vsyncpa [#allocation4], 0  ;;  %s7069_s17 = smov 0  }
   0x5 LB: > { %8019 = sst [smem:[#allocation6_spill]] %s7002_s17  ;;  %s7075_s18 = sadd.s32 4294967295, %s7002_s17   ;;  %s7002_s17 = sphi %s7069_s17, %s22_s17  }
   0x6   : > { %p6085_p0 = scmp.ge.s32.totalorder %s7002_s17, 1  ;;  %p412_p1 = scmp.lt.s32.totalorder %s7002_s17, 3 }
   0x8   : > { %p413_p2 = pnand %p6085_p0, %p412_p1 }
   0x9   : > { %p481_p3 = scmp.lt.s32.totalorder (!%p413_p2), %s7075_s18, 1  ;;  %s8020_s1 = sld [smem:[#allocation7_spill]] (!%p413_p2) }
   0xa   : > { %416 = sbr.rel (%p413_p2) target bundleno = 2108 (0x83c), region = 64  ;;  %s8021_s2 = sld [smem:[#allocation8_spill]] (!%p413_p2) }
   0xb   : > { %s8022_s3 = sld [smem:[#allocation9_spill]] (!%p413_p2)  ;;  %p6095_p4 = scmp.ne.s32.totalorder (!%p413_p2), %s7075_s18, 0 }
   0xf   : > { %s7081_s19 = scalar_select %p481_p3, %s7075_s18, 1 }
  0x11   : > { %s6219_s20 = sshll.u32 %s7081_s19, 9  ;;  %s6088_s21 = sshll.u32 %s7081_s19, 4 }
  0x12   : > { %s7088_s24 = scalar_lea.vmem %s8020_s1, %s6219_s20  ;;  %s7093_s27 = scalar_lea.vmem %s8021_s2, %s6088_s21 }
  0x13   : > { %s6220_s28 = sshll.u32 %s7081_s19, 5  ;;  %s505_s21 = scalar_lea.vmem %s8009_s6, %s7081_s19 }
  0x14   : > { %s7103_s15 = scalar_lea.vmem %s8022_s3, %s6220_s28  ;;  %s7108_s20 = scalar_lea.vmem %s8008_s5, %s6220_s28 }
  0x15   : > { %s6222_s25 = sshll.u32 %s7081_s19, 7  ;;  %s513_s13 = scalar_lea.vmem %s8011_s8, %s7081_s19 }
  0x16   : > { %s7118_s29 = scalar_lea.vmem %s8010_s7, %s6222_s25  ;;  %s516_s17 = scalar_lea.vmem %s8012_s9, %s7081_s19 }
  0x17   : > { %s519_s3 = scalar_lea.vmem %s8013_s10, %s7081_s19  ;;  %523 = sbr.rel (%p6095_p4) target bundleno = 30 (0x1e), region = 68 }
  0x1c   : > { %v524_v0 = vld [vmem:[%s8003_s0] sm:$0xff]  ;;  %vm525_vm0 = vcmask 261120  }
  0x1d   : > { %526 = vst.msk [vmem:[#allocation2] sm:$0xff] %vm525_vm0, %v524_v0 }
  0x1e PF: > { %v532_v1 = vld [vmem:[%s7088_s24 + $0x18] sm:$0xff]  ;;  %v7004_v3 = vmov 0.0   ;;  %v531_v4 = vld [vmem:[%s7088_s24 + $0x10] sm:$0xff]  ;;  %v530_v6 = vld [vmem:[%s7088_s24 + $0x8] sm:$0xff]  ;;  %vm705_vm1 = vcmask 261120   ;;  %vm7005_vm2 = vmmov 0   ;;  %s8023_s12 = scalar_lea.vmem %s8007_s4, %s7081_s19 }
  0x1f   : > { %v544_v2 = vld [vmem:[%s7088_s24 + $0x78] sm:$0xff]  ;;  %6421 = vmatprep.subr.mxu0 %v7004_v3  ;;  %6454 = vmatprep.subr.mxu1 %v7004_v3  ;;  %v543_v5 = vld [vmem:[%s7088_s24 + $0x70] sm:$0xff]  ;;  %v542_v7 = vld [vmem:[%s7088_s24 + $0x68] sm:$0xff]  ;;  %s7006_s1 = smov 126   ;;  %vm1832_vm3 = vcmask 15360   ;;  %vm3062_vm4 = vcmask 64512  }
  0x20   : > { %6422 = vmatpush3.msra.mxu0 %v532_v1  ;;  %6455 = vmatpush3.msra.mxu1 %v544_v2  ;;  %v529_v8 = vld [vmem:[%s7088_s24] sm:$0xff]  ;;  %v536_v11 = vld [vmem:[%s7088_s24 + $0x38] sm:$0xff]  ;;  %v535_v13 = vld [vmem:[%s7088_s24 + $0x30] sm:$0xff]  ;;  %s7007_s2 = smov 124   ;;  %vm4474_vm5 = vcmask 1041408   ;;  %p6214_p5 = scmp.ne.s32.totalorder %s7075_s18, 1 }
  0x21   : > { %6423 = vmatprep.subr.mxu0 %v7004_v3  ;;  %6456 = vmatprep.subr.mxu1 %v7004_v3  ;;  %v541_v9 = vld [vmem:[%s7088_s24 + $0x60] sm:$0xff]  ;;  %v552_v12 = vld [vmem:[%s7088_s24 + $0xb8] sm:$0xff]  ;;  %v551_v14 = vld [vmem:[%s7088_s24 + $0xb0] sm:$0xff] }
  0x22   : > { %6424 = vmatpush3.msra.mxu0 %v531_v4  ;;  %6457 = vmatpush3.msra.mxu1 %v543_v5  ;;  %v534_v15 = vld [vmem:[%s7088_s24 + $0x28] sm:$0xff]  ;;  %v533_v17 = vld [vmem:[%s7088_s24 + $0x20] sm:$0xff]  ;;  %v540_v19 = vld [vmem:[%s7088_s24 + $0x58] sm:$0xff] }
  0x23   : > { %6425 = vmatprep.subr.mxu0 %v7004_v3  ;;  %6458 = vmatprep.subr.mxu1 %v7004_v3  ;;  %v550_v16 = vld [vmem:[%s7088_s24 + $0xa8] sm:$0xff]  ;;  %v549_v18 = vld [vmem:[%s7088_s24 + $0xa0] sm:$0xff]  ;;  %v560_v20 = vld [vmem:[%s7088_s24 + $0xf8] sm:$0xff] }
  0x24   : > { %6426 = vmatpush3.msra.mxu0 %v530_v6  ;;  %6459 = vmatpush3.msra.mxu1 %v542_v7  ;;  %v7150_v10 = vld [vmem:[#allocation2] sm:$0xff]  ;;  %v539_v21 = vld [vmem:[%s7088_s24 + $0x50] sm:$0xff]  ;;  %v538_v23 = vld [vmem:[%s7088_s24 + $0x48] sm:$0xff] }
  0x25   : > { %6427 = vmatprep.subr.mxu0 %v7004_v3  ;;  %6460 = vmatprep.subr.mxu1 %v7004_v3  ;;  %v559_v22 = vld [vmem:[%s7088_s24 + $0xf0] sm:$0xff]  ;;  %v558_v24 = vld [vmem:[%s7088_s24 + $0xe8] sm:$0xff]  ;;  %v537_v25 = vld [vmem:[%s7088_s24 + $0x40] sm:$0xff] }
  0x26   : > { %6428 = vmatpush3.msra.mxu0 %v529_v8  ;;  %6429 = vmatprep.mubr.msk.f32.mxu0 %vm7005_vm2, %v7004_v3  ;;  %v557_v26 = vld [vmem:[%s7088_s24 + $0xe0] sm:$0xff]  ;;  %v548_v27 = vld [vmem:[%s7088_s24 + $0x98] sm:$0xff]  ;;  %v547_v29 = vld [vmem:[%s7088_s24 + $0x90] sm:$0xff] }
  0x27   : > { %6461 = vmatpush3.msra.mxu1 %v541_v9  ;;  %6430 = vmatmul.mubr.msk.f32.vlgmr.msra.gmra.mxu0 %vm705_vm1, %v7150_v10  ;;  %v568_v28 = vld [vmem:[%s7088_s24 + $0x138] sm:$0xff]  ;;  %v567_v30 = vld [vmem:[%s7088_s24 + $0x130] sm:$0xff]  ;;  %v546_v31 = vld [vmem:[%s7088_s24 + $0x88] sm:$0xff] }
  0x28   : > { %6432 = vmatprep.subr.mxu0 %v7004_v3  ;;  %6462 = vmatprep.mubr.msk.f32.mxu1 %vm7005_vm2, %v7004_v3  ;;  %v566_v32 = vld [vmem:[%s7088_s24 + $0x128] sm:$0xff]  ;;  %v545_v33 = vld [vmem:[%s7088_s24 + $0x80] sm:$0xff]  ;;  %v556_v35 = vld [vmem:[%s7088_s24 + $0xd8] sm:$0xff] }
  0x29   : > { %6476 = vmatprep.subr.mxu1 %v7004_v3  ;;  %6433 = vmatpush3.msra.mxu0 %v536_v11  ;;  %v565_v34 = vld [vmem:[%s7088_s24 + $0x120] sm:$0xff]  ;;  %v576_v36 = vld [vmem:[%s7088_s24 + $0x178] sm:$0xff]  ;;  %v555_v37 = vld [vmem:[%s7088_s24 + $0xd0] sm:$0xff] }
  0x2a   : > { %6463 = vmatmul.mubr.msk.f32.vlgmr.msra.gmra.mxu1 %vm705_vm1, %v7150_v10  ;;  %6434 = vmatprep.subr.mxu0 %v7004_v3  ;;  %v575_v38 = vld [vmem:[%s7088_s24 + $0x170] sm:$0xff]  ;;  %v554_v39 = vld [vmem:[%s7088_s24 + $0xc8] sm:$0xff]  ;;  %v553_v41 = vld [vmem:[%s7088_s24 + $0xc0] sm:$0xff] }
  0x2b   : > { %6477 = vmatpush3.msra.mxu1 %v552_v12  ;;  %6435 = vmatpush3.msra.mxu0 %v535_v13  ;;  %v574_v40 = vld [vmem:[%s7088_s24 + $0x168] sm:$0xff]  ;;  %v573_v42 = vld [vmem:[%s7088_s24 + $0x160] sm:$0xff]  ;;  %v564_v43 = vld [vmem:[%s7088_s24 + $0x118] sm:$0xff] }
  0x2c   : > { %6478 = vmatprep.subr.mxu1 %v7004_v3  ;;  %6436 = vmatprep.subr.mxu0 %v7004_v3  ;;  %v584_v44 = vld [vmem:[%s7088_s24 + $0x1b8] sm:$0xff]  ;;  %v563_v45 = vld [vmem:[%s7088_s24 + $0x110] sm:$0xff]  ;;  %v562_v47 = vld [vmem:[%s7088_s24 + $0x108] sm:$0xff] }
  0x2d   : > { %6479 = vmatpush3.msra.mxu1 %v551_v14  ;;  %6437 = vmatpush3.msra.mxu0 %v534_v15  ;;  %v583_v46 = vld [vmem:[%s7088_s24 + $0x1b0] sm:$0xff]  ;;  %v582_v48 = vld [vmem:[%s7088_s24 + $0x1a8] sm:$0xff]  ;;  %v561_v49 = vld [vmem:[%s7088_s24 + $0x100] sm:$0xff] }
  0x2e   : > { %6480 = vmatprep.subr.mxu1 %v7004_v3  ;;  %6438 = vmatprep.subr.mxu0 %v7004_v3  ;;  %v581_v50 = vld [vmem:[%s7088_s24 + $0x1a0] sm:$0xff]  ;;  %v572_v51 = vld [vmem:[%s7088_s24 + $0x158] sm:$0xff]  ;;  %v571_v53 = vld [vmem:[%s7088_s24 + $0x150] sm:$0xff] }
  0x2f   : > { %6481 = vmatpush3.msra.mxu1 %v550_v16  ;;  %6439 = vmatpush3.msra.mxu0 %v533_v17  ;;  %v592_v52 = vld [vmem:[%s7088_s24 + $0x1f8] sm:$0xff]  ;;  %v591_v54 = vld [vmem:[%s7088_s24 + $0x1f0] sm:$0xff]  ;;  %v570_v55 = vld [vmem:[%s7088_s24 + $0x148] sm:$0xff] }
  0x30   : > { %6482 = vmatprep.subr.mxu1 %v7004_v3  ;;  %6440 = vmatprep.mubr.msk.f32.mxu0 %vm7005_vm2, %v7004_v3  ;;  %v590_v56 = vld [vmem:[%s7088_s24 + $0x1e8] sm:$0xff]  ;;  %v569_v57 = vld [vmem:[%s7088_s24 + $0x140] sm:$0xff]  ;;  %v580_v59 = vld [vmem:[%s7088_s24 + $0x198] sm:$0xff] }
  0x31   : > { %6483 = vmatpush3.msra.mxu1 %v549_v18  ;;  %6441 = vmatmul.mubr.msk.f32.vlgmr.msra.gmra.mxu0 %vm705_vm1, %v7150_v10  ;;  %v589_v58 = vld [vmem:[%s7088_s24 + $0x1e0] sm:$0xff]  ;;  %v579_v60 = vld [vmem:[%s7088_s24 + $0x190] sm:$0xff]  ;;  %v578_v61 = vld [vmem:[%s7088_s24 + $0x188] sm:$0xff] }
  0x32   : > { %6443 = vmatprep.subr.mxu0 %v7004_v3  ;;  %6484 = vmatprep.mubr.msk.f32.mxu1 %vm7005_vm2, %v7004_v3  ;;  %v577_v62 = vld [vmem:[%s7088_s24 + $0x180] sm:$0xff]  ;;  %v588_v63 = vld [vmem:[%s7088_s24 + $0x1d8] sm:$0xff]  ;;  %v587_v0 = vld [vmem:[%s7088_s24 + $0x1d0] sm:$0xff] }
  0x33   : > { %6498 = vmatprep.subr.mxu1 %v7004_v3  ;;  %6444 = vmatpush3.msra.mxu0 %v540_v19  ;;  %v586_v1 = vld [vmem:[%s7088_s24 + $0x1c8] sm:$0xff]  ;;  %v585_v2 = vld [vmem:[%s7088_s24 + $0x1c0] sm:$0xff] }
  0x34   : > { %6485 = vmatmul.mubr.msk.f32.vlgmr.msra.gmra.mxu1 %vm705_vm1, %v7150_v10  ;;  %6445 = vmatprep.subr.mxu0 %v7004_v3  ;;  %v6096_v4 = vld [vmem:[%s7093_s27] ss:$0 sm:$0xff]  ;;  %v6098_v16 = vld [vmem:[%s7093_s27 + $0x2] ss:$0 sm:$0xff]  ;;  %v6099_v18 = vld [vmem:[%s7093_s27 + $0x3] ss:$0 sm:$0xff] }
  0x35   : > { %6499 = vmatpush3.msra.mxu1 %v560_v20  ;;  %6446 = vmatpush3.msra.mxu0 %v539_v21 }
  0x36   : > { %6500 = vmatprep.subr.mxu1 %v7004_v3  ;;  %6447 = vmatprep.subr.mxu0 %v7004_v3 }
  0x37   : > { %6501 = vmatpush3.msra.mxu1 %v559_v22  ;;  %6448 = vmatpush3.msra.mxu0 %v538_v23  ;;  %v6101_v23 = vld [vmem:[%s7093_s27 + $0x5] ss:$0 sm:$0xff] }
  0x38   : > { %6502 = vmatprep.subr.mxu1 %v7004_v3  ;;  %6449 = vmatprep.subr.mxu0 %v7004_v3 }
  0x39   : > { %6503 = vmatpush3.msra.mxu1 %v558_v24  ;;  %6450 = vmatpush3.msra.mxu0 %v537_v25 }
  0x3a   : > { %6504 = vmatprep.subr.mxu1 %v7004_v3  ;;  %6451 = vmatprep.mubr.msk.f32.mxu0 %vm7005_vm2, %v7004_v3 }
  0x3b   : > { %6505 = vmatpush3.msra.mxu1 %v557_v26  ;;  %6452 = vmatmul.mubr.msk.f32.vlgmr.msra.gmra.mxu0 %vm705_vm1, %v7150_v10  ;;  %v6100_v26 = vld [vmem:[%s7093_s27 + $0x4] ss:$0 sm:$0xff] }
  0x3c   : > { %6465 = vmatprep.subr.mxu0 %v7004_v3  ;;  %6506 = vmatprep.mubr.msk.f32.mxu1 %vm7005_vm2, %v7004_v3 }
  0x3d   : > { %6520 = vmatprep.subr.mxu1 %v7004_v3  ;;  %6466 = vmatpush3.msra.mxu0 %v548_v27  ;;  %v6103_v27 = vld [vmem:[%s7093_s27 + $0x7] ss:$0 sm:$0xff] }
  0x3e   : > { %6507 = vmatmul.mubr.msk.f32.vlgmr.msra.gmra.mxu1 %vm705_vm1, %v7150_v10  ;;  %6467 = vmatprep.subr.mxu0 %v7004_v3 }
  0x3f   : > { %6521 = vmatpush3.msra.mxu1 %v568_v28  ;;  %6468 = vmatpush3.msra.mxu0 %v547_v29 }
  0x40   : > { %6522 = vmatprep.subr.mxu1 %v7004_v3  ;;  %6469 = vmatprep.subr.mxu0 %v7004_v3 }
  0x41   : > { %6523 = vmatpush3.msra.mxu1 %v567_v30  ;;  %6470 = vmatpush3.msra.mxu0 %v546_v31 }
  0x42   : > { %6524 = vmatprep.subr.mxu1 %v7004_v3  ;;  %6471 = vmatprep.subr.mxu0 %v7004_v3 }
  0x43   : > { %6525 = vmatpush3.msra.mxu1 %v566_v32  ;;  %6472 = vmatpush3.msra.mxu0 %v545_v33  ;;  %v6105_v32 = vld [vmem:[%s7093_s27 + $0x9] ss:$0 sm:$0xff] }
  0x44   : > { %6526 = vmatprep.subr.mxu1 %v7004_v3  ;;  %6473 = vmatprep.mubr.msk.f32.mxu0 %vm7005_vm2, %v7004_v3 }
  0x45   : > { %6527 = vmatpush3.msra.mxu1 %v565_v34  ;;  %6474 = vmatmul.mubr.msk.f32.vlgmr.msra.gmra.mxu0 %vm705_vm1, %v7150_v10 }
  0x46   : > { %6487 = vmatprep.subr.mxu0 %v7004_v3  ;;  %6528 = vmatprep.mubr.msk.f32.mxu1 %vm7005_vm2, %v7004_v3 }
  0x47   : > { %6542 = vmatprep.subr.mxu1 %v7004_v3  ;;  %6488 = vmatpush3.msra.mxu0 %v556_v35 }
  0x48   : > { %6529 = vmatmul.mubr.msk.f32.vlgmr.msra.gmra.mxu1 %vm705_vm1, %v7150_v10  ;;  %6489 = vmatprep.subr.mxu0 %v7004_v3 }
  0x49   : > { %6543 = vmatpush3.msra.mxu1 %v576_v36  ;;  %6490 = vmatpush3.msra.mxu0 %v555_v37  ;;  %v6102_v36 = vld [vmem:[%s7093_s27 + $0x6] ss:$0 sm:$0xff] }
  0x4a   : > { %6544 = vmatprep.subr.mxu1 %v7004_v3  ;;  %6491 = vmatprep.subr.mxu0 %v7004_v3 }
  0x4b   : > { %6545 = vmatpush3.msra.mxu1 %v575_v38  ;;  %6492 = vmatpush3.msra.mxu0 %v554_v39  ;;  %v6107_v39 = vld [vmem:[%s7093_s27 + $0xb] ss:$0 sm:$0xff] }
  0x4c   : > { %6546 = vmatprep.subr.mxu1 %v7004_v3  ;;  %6493 = vmatprep.subr.mxu0 %v7004_v3 }
  0x4d   : > { %6547 = vmatpush3.msra.mxu1 %v574_v40  ;;  %6494 = vmatpush3.msra.mxu0 %v553_v41 }
  0x4e   : > { %6548 = vmatprep.subr.mxu1 %v7004_v3  ;;  %6495 = vmatprep.mubr.msk.f32.mxu0 %vm7005_vm2, %v7004_v3 }
  0x4f   : > { %6549 = vmatpush3.msra.mxu1 %v573_v42  ;;  %6496 = vmatmul.mubr.msk.f32.vlgmr.msra.gmra.mxu0 %vm705_vm1, %v7150_v10 }
  0x50   : > { %6509 = vmatprep.subr.mxu0 %v7004_v3  ;;  %6550 = vmatprep.mubr.msk.f32.mxu1 %vm7005_vm2, %v7004_v3 }
  0x51   : > { %6564 = vmatprep.subr.mxu1 %v7004_v3  ;;  %6510 = vmatpush3.msra.mxu0 %v564_v43 }
  0x52   : > { %6551 = vmatmul.mubr.msk.f32.vlgmr.msra.gmra.mxu1 %vm705_vm1, %v7150_v10  ;;  %6511 = vmatprep.subr.mxu0 %v7004_v3 }
  0x53   : > { %6565 = vmatpush3.msra.mxu1 %v584_v44  ;;  %6512 = vmatpush3.msra.mxu0 %v563_v45  ;;  %v6104_v44 = vld [vmem:[%s7093_s27 + $0x8] ss:$0 sm:$0xff]  ;;  %v6109_v45 = vld [vmem:[%s7093_s27 + $0xd] ss:$0 sm:$0xff] }
  0x54   : > { %6566 = vmatprep.subr.mxu1 %v7004_v3  ;;  %6513 = vmatprep.subr.mxu0 %v7004_v3 }
  0x55   : > { %6567 = vmatpush3.msra.mxu1 %v583_v46  ;;  %6514 = vmatpush3.msra.mxu0 %v562_v47 }
  0x56   : > { %6568 = vmatprep.subr.mxu1 %v7004_v3  ;;  %6515 = vmatprep.subr.mxu0 %v7004_v3 }
  0x57   : > { %6569 = vmatpush3.msra.mxu1 %v582_v48  ;;  %6516 = vmatpush3.msra.mxu0 %v561_v49 }
  0x58   : > { %6570 = vmatprep.subr.mxu1 %v7004_v3  ;;  %6517 = vmatprep.mubr.msk.f32.mxu0 %vm7005_vm2, %v7004_v3 }
  0x59   : > { %6571 = vmatpush3.msra.mxu1 %v581_v50  ;;  %6572 = vmatprep.mubr.msk.f32.mxu1 %vm7005_vm2, %v7004_v3 }
  0x5a   : > { %6518 = vmatmul.mubr.msk.f32.vlgmr.msra.gmra.mxu0 %vm705_vm1, %v7150_v10  ;;  %6531 = vmatprep.subr.mxu0 %v7004_v3 }
  0x5b   : > { %6573 = vmatmul.mubr.msk.f32.vlgmr.msra.gmra.mxu1 %vm705_vm1, %v7150_v10  ;;  %6586 = vmatprep.subr.mxu1 %v7004_v3 }
  0x5c   : > { %6532 = vmatpush3.msra.mxu0 %v572_v51  ;;  %6587 = vmatpush3.msra.mxu1 %v592_v52  ;;  %v6106_v52 = vld [vmem:[%s7093_s27 + $0xa] ss:$0 sm:$0xff] }
  0x5d   : > { %6533 = vmatprep.subr.mxu0 %v7004_v3  ;;  %6588 = vmatprep.subr.mxu1 %v7004_v3 }
  0x5e   : > { %6534 = vmatpush3.msra.mxu0 %v571_v53  ;;  %6589 = vmatpush3.msra.mxu1 %v591_v54  ;;  %v6111_v53 = vld [vmem:[%s7093_s27 + $0xf] ss:$0 sm:$0xff] }
  0x5f   : > { %6535 = vmatprep.subr.mxu0 %v7004_v3  ;;  %6590 = vmatprep.subr.mxu1 %v7004_v3 }
  0x60   : > { %6536 = vmatpush3.msra.mxu0 %v570_v55  ;;  %6591 = vmatpush3.msra.mxu1 %v590_v56 }
  0x61   : > { %6537 = vmatprep.subr.mxu0 %v7004_v3  ;;  %6592 = vmatprep.subr.mxu1 %v7004_v3 }
  0x62   : > { %6538 = vmatpush3.msra.mxu0 %v569_v57  ;;  %6539 = vmatprep.mubr.msk.f32.mxu0 %vm7005_vm2, %v7004_v3 }
  0x63   : > { %6593 = vmatpush3.msra.mxu1 %v589_v58  ;;  %6594 = vmatprep.mubr.msk.f32.mxu1 %vm7005_vm2, %v7004_v3 }
  0x64   : > { %6540 = vmatmul.mubr.msk.f32.vlgmr.msra.gmra.mxu0 %vm705_vm1, %v7150_v10  ;;  %6553 = vmatprep.subr.mxu0 %v7004_v3 }
  0x65   : > { %6595 = vmatmul.mubr.msk.f32.vlgmr.msra.gmra.mxu1 %vm705_vm1, %v7150_v10  ;;  %6554 = vmatpush3.msra.mxu0 %v580_v59 }
  0x66   : > { %6555 = vmatprep.subr.mxu0 %v7004_v3  ;;  %6561 = vmatprep.mubr.msk.f32.mxu0 %vm7005_vm2, %v7004_v3 }
  0x67   : > { %6556 = vmatpush3.msra.mxu0 %v579_v60  ;;  %6612 = vmatprep.subr.mxu1 %v7004_v3  ;;  %v6108_v60 = vld [vmem:[%s7093_s27 + $0xc] ss:$0 sm:$0xff] }
  0x68   : > { %6557 = vmatprep.subr.mxu0 %v7004_v3  ;;  %6614 = vmatprep.mubr.msk.f32.mxu1 %vm7005_vm2, %v7004_v3 }
  0x69   : > { %6558 = vmatpush3.msra.mxu0 %v578_v61 }
  0x6a   : > { %6559 = vmatprep.subr.mxu0 %v7004_v3 }
  0x6b   : > { %6560 = vmatpush3.msra.mxu0 %v577_v62 }
  0x6c   : > { %6562 = vmatmul.mubr.msk.f32.vlgmr.msra.gmra.mxu0 %vm705_vm1, %v7150_v10  ;;  %6575 = vmatprep.subr.mxu0 %v7004_v3 }
  0x6d   : > { %6576 = vmatpush3.msra.mxu0 %v588_v63  ;;  %6583 = vmatprep.mubr.msk.f32.mxu0 %vm7005_vm2, %v7004_v3 }
  0x6e   : > { %6577 = vmatprep.subr.mxu0 %v7004_v3 }
  0x6f   : > { %6578 = vmatpush3.msra.mxu0 %v587_v0  ;;  %v6110_v0 = vld [vmem:[%s7093_s27 + $0xe] ss:$0 sm:$0xff] }
  0x70   : > { %6579 = vmatprep.subr.mxu0 %v7004_v3 }
  0x71   : > { %6580 = vmatpush3.msra.mxu0 %v586_v1 }
  0x72   : > { %6581 = vmatprep.subr.mxu0 %v7004_v3 }
  0x73   : > { %6582 = vmatpush3.msra.mxu0 %v585_v2 }
  0x74   : > { %6584 = vmatmul.mubr.msk.f32.vlgmr.msra.gmra.mxu0 %vm705_vm1, %v7150_v10  ;;  %6597 = vmatprep.subr.mxu0 %v7004_v3  ;;  %v6097_v10 = vld [vmem:[%s7093_s27 + $0x1] ss:$0 sm:$0xff] }
  0x75   : > { %6599 = vmatprep.mubr.msk.f32.mxu0 %vm7005_vm2, %v7004_v3 }
  0xe7   : > { %v775_v5 = vpop.f32.mrf.mxu0 }
  0xe8   : > { %v7337_v6 = vadd.f32 %v6096_v4, %v775_v5 }
  0xe9   : > { %v6431_v7 = vpop.f32.mrf.mxu0 }
  0xea   : > { %1830 = vrot.lane.b32.xlu0 %v7337_v6, %s7006_s1  ;;  %v985_v8 = vpop.f32.mrf.mxu1 }
  0xeb   : > { %v7350_v21 = vadd.f32 %v6099_v18, %v985_v8 }
  0xec   : > { %v6464_v9 = vpop.f32.mrf.mxu1 }
  0xf1   : > { %v845_v11 = vpop.f32.mrf.mxu0 }
  0xf2   : > { %v7342_v12 = vadd.f32 %v6097_v10, %v845_v11 }
  0xf3   : > { %v6442_v13 = vpop.f32.mrf.mxu0 }
  0xf4   : > { %1908 = vrot.lane.b32.xlu0 %v7342_v12, %s7006_s1  ;;  %v1125_v14 = vpop.f32.mrf.mxu1 }
  0xf5   : > { %v7357_v25 = vadd.f32 %v6101_v23, %v1125_v14 }
  0xf6   : > { %v6486_v15 = vpop.f32.mrf.mxu1 }
  0xfb   : > { %v915_v17 = vpop.f32.mrf.mxu0 }
  0xfc   : > { %v7348_v19 = vadd.f32 %v6098_v16, %v915_v17 }
  0xfd   : > { %v6453_v20 = vpop.f32.mrf.mxu0 }
  0xfe   : > { %1985 = vrot.lane.b32.xlu1 %v7348_v19, %s7006_s1  ;;  %v1265_v22 = vpop.f32.mrf.mxu1 }
  0xff   : > { %v7365_v30 = vadd.f32 %v6103_v27, %v1265_v22 }
 0x100   : > { %v6508_v24 = vpop.f32.mrf.mxu1 }
 0x102   : > { %2062 = vrot.lane.b32.xlu1 %v7350_v21, %s7006_s1 }
 0x105   : > { %v1055_v28 = vpop.f32.mrf.mxu0 }
 0x106   : > { %v7361_v29 = vadd.f32 %v6100_v26, %v1055_v28  ;;  %2216 = vrot.lane.b32.xlu1 %v7357_v25, %s7006_s1 }
 0x107   : > { %v6475_v31 = vpop.f32.mrf.mxu0 }
 0x108   : > { %2139 = vrot.lane.b32.xlu0 %v7361_v29, %s7006_s1  ;;  %v1405_v33 = vpop.f32.mrf.mxu1 }
 0x109   : > { %v7372_v34 = vadd.f32 %v6105_v32, %v1405_v33 }
 0x10a   : > { %2370 = vrot.lane.b32.xlu1 %v7365_v30, %s7006_s1  ;;  %v6530_v35 = vpop.f32.mrf.mxu1 }
 0x10e   : > { %2524 = vrot.lane.b32.xlu1 %v7372_v34, %s7006_s1 }
 0x10f   : > { %v1195_v37 = vpop.f32.mrf.mxu0 }
 0x110   : > { %v7377_v38 = vadd.f32 %v6102_v36, %v1195_v37 }
 0x111   : > { %v6497_v40 = vpop.f32.mrf.mxu0 }
 0x112   : > { %2293 = vrot.lane.b32.xlu0 %v7377_v38, %s7006_s1  ;;  %v1545_v41 = vpop.f32.mrf.mxu1 }
 0x113   : > { %v7382_v42 = vadd.f32 %v6107_v39, %v1545_v41 }
 0x114   : > { %v6552_v43 = vpop.f32.mrf.mxu1 }
 0x115   : > { %2678 = vrot.lane.b32.xlu1 %v7382_v42, %s7006_s1 }
 0x11a   : > { %v1335_v46 = vpop.f32.mrf.mxu0 }
 0x11b   : > { %v7388_v47 = vadd.f32 %v6104_v44, %v1335_v46  ;;  %v1685_v48 = vpop.f32.mrf.mxu1 }
 0x11c   : > { %v7390_v49 = vadd.f32 %v6109_v45, %v1685_v48  ;;  %v6519_v50 = vpop.f32.mrf.mxu0 }
 0x11d   : > { %2447 = vrot.lane.b32.xlu0 %v7388_v47, %s7006_s1  ;;  %v6574_v51 = vpop.f32.mrf.mxu1 }
 0x11e   : > { %2832 = vrot.lane.b32.xlu1 %v7390_v49, %s7006_s1 }
 0x124   : > { %v1475_v54 = vpop.f32.mrf.mxu0 }
 0x125   : > { %v7398_v55 = vadd.f32 %v6106_v52, %v1475_v54  ;;  %v1825_v56 = vpop.f32.mrf.mxu1 }
 0x126   : > { %v7400_v57 = vadd.f32 %v6111_v53, %v1825_v56  ;;  %v6541_v58 = vpop.f32.mrf.mxu0 }
 0x127   : > { %2601 = vrot.lane.b32.xlu0 %v7398_v55, %s7006_s1  ;;  %v6596_v59 = vpop.f32.mrf.mxu1 }
 0x128   : > { %2986 = vrot.lane.b32.xlu1 %v7400_v57, %s7006_s1 }
 0x12c   : > { %v1615_v61 = vpop.f32.mrf.mxu0 }
 0x12d   : > { %v7407_v62 = vadd.f32 %v6108_v60, %v1615_v61 }
 0x12e   : > { %v6563_v63 = vpop.f32.mrf.mxu0 }
 0x12f   : > { %2755 = vrot.lane.b32.xlu0 %v7407_v62, %s7006_s1 }
 0x134   : > { %v1755_v1 = vpop.f32.mrf.mxu0 }
 0x135   : > { %v7412_v2 = vadd.f32 %v6110_v0, %v1755_v1 }
 0x136   : > { %v6585_v4 = vpop.f32.mrf.mxu0 }
 0x137   : > { %2909 = vrot.lane.b32.xlu0 %v7412_v2, %s7006_s1 }
 0x15c   : > { %v1831_v5 = vpop.permute.xlu0 %1830 }
 0x15d   : > { %6598 = vmatpush3.xpose.msk.msra.mxu0 %vm1832_vm3, %v1831_v5 }
 0x15e   : > { %6602 = vmatprep.subr.mxu0 %v7004_v3 }
 0x160   : > { %6600 = vmatmul.mubr.msk.f32.vlgmr.msra.gmra.mxu0 %vm1832_vm3, %v7337_v6 }
 0x161   : > { %6604 = vmatprep.mubr.msk.f32.mxu0 %vm7005_vm2, %v7004_v3 }
 0x166   : > { %v1909_v7 = vpop.permute.xlu0 %1908 }
 0x167   : > { %6603 = vmatpush3.xpose.msk.msra.mxu0 %vm1832_vm3, %v1909_v7 }
 0x168   : > { %6607 = vmatprep.subr.mxu0 %v7004_v3 }
 0x16a   : > { %6605 = vmatmul.mubr.msk.f32.vlgmr.msra.gmra.mxu0 %vm1832_vm3, %v7342_v12 }
 0x16b   : > { %6609 = vmatprep.mubr.msk.f32.mxu0 %vm7005_vm2, %v7004_v3 }
 0x170   : > { %v1986_v8 = vpop.permute.xlu1 %1985 }
 0x171   : > { %6608 = vmatpush3.xpose.msk.msra.mxu0 %vm1832_vm3, %v1986_v8 }
 0x172   : > { %6617 = vmatprep.subr.mxu0 %v7004_v3 }
 0x174   : > { %6610 = vmatmul.mubr.msk.f32.vlgmr.msra.gmra.mxu0 %vm1832_vm3, %v7348_v19  ;;  %v2063_v9 = vpop.permute.xlu1 %2062 }
 0x175   : > { %6613 = vmatpush3.xpose.msk.msra.mxu1 %vm1832_vm3, %v2063_v9  ;;  %6619 = vmatprep.mubr.msk.f32.mxu0 %vm7005_vm2, %v7004_v3 }
 0x176   : > { %6622 = vmatprep.subr.mxu1 %v7004_v3 }
 0x178   : > { %6615 = vmatmul.mubr.msk.f32.vlgmr.msra.gmra.mxu1 %vm1832_vm3, %v7350_v21  ;;  %v2217_v10 = vpop.permute.xlu1 %2216 }
 0x179   : > { %6623 = vmatpush3.xpose.msk.msra.mxu1 %vm1832_vm3, %v2217_v10  ;;  %6624 = vmatprep.mubr.msk.f32.mxu1 %vm7005_vm2, %v7004_v3 }
 0x17a   : > { %v2140_v11 = vpop.permute.xlu0 %2139  ;;  %6632 = vmatprep.subr.mxu1 %v7004_v3 }
 0x17b   : > { %6618 = vmatpush3.xpose.msk.msra.mxu0 %vm1832_vm3, %v2140_v11 }
 0x17c   : > { %6625 = vmatmul.mubr.msk.f32.vlgmr.msra.gmra.mxu1 %vm1832_vm3, %v7357_v25  ;;  %v2371_v13 = vpop.permute.xlu1 %2370  ;;  %6627 = vmatprep.subr.mxu0 %v7004_v3 }
 0x17d   : > { %6633 = vmatpush3.xpose.msk.msra.mxu1 %vm1832_vm3, %v2371_v13  ;;  %6634 = vmatprep.mubr.msk.f32.mxu1 %vm7005_vm2, %v7004_v3 }
 0x17e   : > { %6620 = vmatmul.mubr.msk.f32.vlgmr.msra.gmra.mxu0 %vm1832_vm3, %v7361_v29  ;;  %6642 = vmatprep.subr.mxu1 %v7004_v3 }
 0x17f   : > { %6629 = vmatprep.mubr.msk.f32.mxu0 %vm7005_vm2, %v7004_v3 }
 0x180   : > { %6635 = vmatmul.mubr.msk.f32.vlgmr.msra.gmra.mxu1 %vm1832_vm3, %v7365_v30  ;;  %v2525_v14 = vpop.permute.xlu1 %2524 }
 0x181   : > { %6643 = vmatpush3.xpose.msk.msra.mxu1 %vm1832_vm3, %v2525_v14  ;;  %6644 = vmatprep.mubr.msk.f32.mxu1 %vm7005_vm2, %v7004_v3 }
 0x182   : > { %6652 = vmatprep.subr.mxu1 %v7004_v3 }
 0x184   : > { %v2294_v15 = vpop.permute.xlu0 %2293  ;;  %6645 = vmatmul.mubr.msk.f32.vlgmr.msra.gmra.mxu1 %vm1832_vm3, %v7372_v34 }
 0x185   : > { %6628 = vmatpush3.xpose.msk.msra.mxu0 %vm1832_vm3, %v2294_v15  ;;  %6654 = vmatprep.mubr.msk.f32.mxu1 %vm7005_vm2, %v7004_v3 }
 0x186   : > { %6637 = vmatprep.subr.mxu0 %v7004_v3 }
 0x187   : > { %v2679_v16 = vpop.permute.xlu1 %2678 }
 0x188   : > { %6630 = vmatmul.mubr.msk.f32.vlgmr.msra.gmra.mxu0 %vm1832_vm3, %v7377_v38  ;;  %6653 = vmatpush3.xpose.msk.msra.mxu1 %vm1832_vm3, %v2679_v16 }
 0x189   : > { %6662 = vmatprep.subr.mxu1 %v7004_v3  ;;  %6639 = vmatprep.mubr.msk.f32.mxu0 %vm7005_vm2, %v7004_v3 }
 0x18b   : > { %6655 = vmatmul.mubr.msk.f32.vlgmr.msra.gmra.mxu1 %vm1832_vm3, %v7382_v42 }
 0x18c   : > { %6664 = vmatprep.mubr.msk.f32.mxu1 %vm7005_vm2, %v7004_v3 }
 0x18f   : > { %v2448_v17 = vpop.permute.xlu0 %2447 }
 0x190   : > { %v2833_v18 = vpop.permute.xlu1 %2832  ;;  %6638 = vmatpush3.xpose.msk.msra.mxu0 %vm1832_vm3, %v2448_v17 }
 0x191   : > { %6663 = vmatpush3.xpose.msk.msra.mxu1 %vm1832_vm3, %v2833_v18  ;;  %6647 = vmatprep.subr.mxu0 %v7004_v3 }
 0x192   : > { %6672 = vmatprep.subr.mxu1 %v7004_v3 }
 0x193   : > { %6640 = vmatmul.mubr.msk.f32.vlgmr.msra.gmra.mxu0 %vm1832_vm3, %v7388_v47 }
 0x194   : > { %6665 = vmatmul.mubr.msk.f32.vlgmr.msra.gmra.mxu1 %vm1832_vm3, %v7390_v49  ;;  %6649 = vmatprep.mubr.msk.f32.mxu0 %vm7005_vm2, %v7004_v3 }
 0x195   : > { %6674 = vmatprep.mubr.msk.f32.mxu1 %vm7005_vm2, %v7004_v3 }
 0x199   : > { %v2602_v20 = vpop.permute.xlu0 %2601 }
 0x19a   : > { %v2987_v22 = vpop.permute.xlu1 %2986  ;;  %6648 = vmatpush3.xpose.msk.msra.mxu0 %vm1832_vm3, %v2602_v20 }
 0x19b   : > { %6673 = vmatpush3.xpose.msk.msra.mxu1 %vm1832_vm3, %v2987_v22  ;;  %6657 = vmatprep.subr.mxu0 %v7004_v3 }
 0x19c   : > { %6682 = vmatprep.subr.mxu1 %v7004_v3 }
 0x19d   : > { %6650 = vmatmul.mubr.msk.f32.vlgmr.msra.gmra.mxu0 %vm1832_vm3, %v7398_v55 }
 0x19e   : > { %6675 = vmatmul.mubr.msk.f32.vlgmr.msra.gmra.mxu1 %vm1832_vm3, %v7400_v57  ;;  %6659 = vmatprep.mubr.msk.f32.mxu0 %vm7005_vm2, %v7004_v3 }
 0x19f   : > { %6684 = vmatprep.mubr.msk.f32.mxu1 %vm7005_vm2, %v7004_v3 }
 0x1a1   : > { %v2756_v23 = vpop.permute.xlu0 %2755 }
 0x1a2   : > { %6658 = vmatpush3.xpose.msk.msra.mxu0 %vm1832_vm3, %v2756_v23 }
 0x1a3   : > { %6667 = vmatprep.subr.mxu0 %v7004_v3 }
 0x1a5   : > { %6660 = vmatmul.mubr.msk.f32.vlgmr.msra.gmra.mxu0 %vm1832_vm3, %v7407_v62 }
 0x1a6   : > { %6669 = vmatprep.mubr.msk.f32.mxu0 %vm7005_vm2, %v7004_v3 }
 0x1a9   : > { %v2910_v24 = vpop.permute.xlu0 %2909 }
 0x1aa   : > { %6668 = vmatpush3.xpose.msk.msra.mxu0 %vm1832_vm3, %v2910_v24 }
 0x1ab   : > { %6677 = vmatprep.subr.mxu0 %v7004_v3 }
 0x1ad   : > { %6670 = vmatmul.mubr.msk.f32.vlgmr.msra.gmra.mxu0 %vm1832_vm3, %v7412_v2 }
 0x1ae   : > { %6679 = vmatprep.mubr.msk.f32.mxu0 %vm7005_vm2, %v7004_v3 }
 0x220   : > { %v7512_v26 = vpop.f32.mrf.mxu0 }
 0x221   : > { %v3063_v27 = vsel %vm3062_vm4, %v7512_v26, -inf }
 0x222   : > { %3064 = vmax.xlane.f32.xlu0 %v3063_v27  ;;  %v6601_v28 = vpop.f32.mrf.mxu0 }
 0x22a   : > { %v7516_v31 = vpop.f32.mrf.mxu0 }
 0x22b   : > { %v3066_v32 = vsel %vm3062_vm4, %v7516_v31, -inf }
 0x22c   : > { %3067 = vmax.xlane.f32.xlu1 %v3066_v32  ;;  %v6606_v33 = vpop.f32.mrf.mxu0 }
 0x234   : > { %v7520_v35 = vpop.f32.mrf.mxu0 }
 0x235   : > { %v3069_v8 = vsel %vm3062_vm4, %v7520_v35, -inf }
 0x236   : > { %v6611_v36 = vpop.f32.mrf.mxu0 }
 0x238   : > { %v7522_v37 = vpop.f32.mrf.mxu1 }
 0x239   : > { %v3072_v39 = vsel %vm3062_vm4, %v7522_v37, -inf }
 0x23a   : > { %v6616_v40 = vpop.f32.mrf.mxu1  ;;  %3073 = vmax.xlane.f32.xlu0 %v3072_v39 }
 0x23c   : > { %v7526_v41 = vpop.f32.mrf.mxu1 }
 0x23d   : > { %3239 = vrot.lane.b32.xlu1 %v7337_v6, %s7007_s2 }
 0x23e   : > { %v7530_v43 = vpop.f32.mrf.mxu0  ;;  %v6626_v44 = vpop.f32.mrf.mxu1 }
 0x240   : > { %v6621_v45 = vpop.f32.mrf.mxu0  ;;  %v7532_v46 = vpop.f32.mrf.mxu1 }
 0x241   : > { %v3084_v9 = vsel %vm3062_vm4, %v7532_v46, -inf }
 0x242   : > { %v6636_v48 = vpop.f32.mrf.mxu1 }
 0x244   : > { %v7534_v50 = vpop.f32.mrf.mxu1 }
 0x245   : > { %v3090_v10 = vsel %vm3062_vm4, %v7534_v50, -inf }
 0x246   : > { %v6646_v51 = vpop.f32.mrf.mxu1 }
 0x248   : > { %v7536_v52 = vpop.f32.mrf.mxu0 }
 0x24a   : > { %v6631_v53 = vpop.f32.mrf.mxu0 }
 0x24b   : > { %v7538_v54 = vpop.f32.mrf.mxu1 }
 0x24c   : > { %v3096_v11 = vsel %vm3062_vm4, %v7538_v54, -inf }
 0x24d   : > { %v6656_v56 = vpop.f32.mrf.mxu1 }
 0x250   : > { %3315 = vrot.lane.b32.xlu0 %v7342_v12, %s7007_s2 }
 0x253   : > { %v7542_v6 = vpop.f32.mrf.mxu0 }
 0x254   : > { %v7544_v58 = vpop.f32.mrf.mxu1  ;;  %3391 = vrot.lane.b32.xlu0 %v7348_v19, %s7007_s2  ;;  %v3075_v19 = vsel %vm3062_vm4, %v7530_v43, -inf }
 0x255   : > { %v6641_v59 = vpop.f32.mrf.mxu0 }
 0x256   : > { %v6666_v60 = vpop.f32.mrf.mxu1 }
 0x258   : > { %3467 = vrot.lane.b32.xlu0 %v7350_v21, %s7007_s2  ;;  %v3081_v21 = vsel %vm3062_vm4, %v7536_v52, -inf }
 0x25c   : > { %3543 = vrot.lane.b32.xlu0 %v7361_v29, %s7007_s2 }
 0x25d   : > { %v7552_v61 = vpop.f32.mrf.mxu0 }
 0x25e   : > { %v7554_v63 = vpop.f32.mrf.mxu1 }
 0x25f   : > { %v6651_v12 = vpop.f32.mrf.mxu0  ;;  %v3108_v13 = vsel %vm3062_vm4, %v7554_v63, -inf }
 0x260   : > { %v6676_v0 = vpop.f32.mrf.mxu1  ;;  %3619 = vrot.lane.b32.xlu0 %v7357_v25, %s7007_s2  ;;  %v3087_v25 = vsel %vm3062_vm4, %v7542_v6, -inf }
 0x261   : > { %3076 = vmax.xlane.f32.xlu1 %v3075_v19 }
 0x264   : > { %3695 = vrot.lane.b32.xlu0 %v7377_v38, %s7007_s2  ;;  %v3093_v38 = vsel %vm3062_vm4, %v7552_v61, -inf }
 0x265   : > { %v7564_v29 = vpop.f32.mrf.mxu0  ;;  %3082 = vmax.xlane.f32.xlu1 %v3081_v21 }
 0x266   : > { %v3099_v7 = vsel %vm3062_vm4, %v7564_v29, -inf }
 0x267   : > { %v6661_v1 = vpop.f32.mrf.mxu0 }
 0x268   : > { %3771 = vrot.lane.b32.xlu0 %v7365_v30, %s7007_s2 }
 0x269   : > { %3088 = vmax.xlane.f32.xlu1 %v3087_v25 }
 0x26c   : > { %3847 = vrot.lane.b32.xlu0 %v7388_v47, %s7007_s2  ;;  %v3078_v47 = vsel %vm3062_vm4, %v7526_v41, -inf }
 0x26d   : > { %v7574_v4 = vpop.f32.mrf.mxu0  ;;  %3094 = vmax.xlane.f32.xlu1 %v3093_v38 }
 0x26e   : > { %v3105_v30 = vsel %vm3062_vm4, %v7574_v4, -inf }
 0x26f   : > { %v6671_v5 = vpop.f32.mrf.mxu0 }
 0x271   : > { %3100 = vmax.xlane.f32.xlu1 %v3099_v7 }
 0x275   : > { %3106 = vmax.xlane.f32.xlu1 %v3105_v30 }
 0x286   : > { %3923 = vrot.lane.b32.xlu1 %v7372_v34, %s7007_s2  ;;  %v3102_v34 = vsel %vm3062_vm4, %v7544_v58, -inf }
 0x28b   : > { %3079 = vmax.xlane.f32.xlu0 %v3078_v47 }
 0x28f   : > { %3070 = vmax.xlane.f32.xlu0 %v3069_v8 }
 0x293   : > { %3085 = vmax.xlane.f32.xlu0 %v3084_v9 }
 0x297   : > { %3091 = vmax.xlane.f32.xlu0 %v3090_v10 }
 0x29b   : > { %3097 = vmax.xlane.f32.xlu0 %v3096_v11 }
 0x29f   : > { %3103 = vmax.xlane.f32.xlu0 %v3102_v34 }
 0x2a3   : > { %3109 = vmax.xlane.f32.xlu0 %v3108_v13 }
 0x2ab   : > { %v3065_v14 = vpop.xlane.xlu0 %3064 }
 0x2ac   : > { %v3111_v15 = vsub.f32 %v7512_v26, %v3065_v14 }
 0x2ae   : > { %v3127_v16 = vmul.f32 1.442695, %v3111_v15 }
 0x2b0   : > { %6902 = vpow2.f32 %v3127_v16 }
 0x2b5   : > { %v3068_v17 = vpop.xlane.xlu1 %3067 }
 0x2b6   : > { %v3112_v26 = vsub.f32 %v7516_v31, %v3068_v17 }
 0x2b8   : > { %v3129_v27 = vmul.f32 1.442695, %v3112_v26 }
 0x2b9   : > { %3999 = vrot.lane.b32.xlu0 %v7398_v55, %s7007_s2  ;;  %v3240_v18 = vpop.permute.xlu1 %3239 }
 0x2ba   : > { %6678 = vmatpush3.msra.mxu0 %v3240_v18 }
 0x2bb   : > { %6687 = vmatprep.subr.mxu0 %v7004_v3 }
 0x2bd   : > { %v7600_v20 = vpop.eup %6902  ;;  %4075 = vrot.lane.b32.xlu0 %v7382_v42, %s7007_s2 }
 0x2be   : > { %v3159_v22 = vsel %vm3062_vm4, %v7600_v20, 0.0 }
 0x2bf   : > { %3160 = vadd.xlane.f32.xlu1 %v3159_v22 }
 0x2c1   : > { %4151 = vrot.lane.b32.xlu0 %v7407_v62, %s7007_s2 }
 0x2c3   : > { %v3074_v23 = vpop.xlane.xlu0 %3073 }
 0x2c4   : > { %v3114_v24 = vsub.f32 %v7522_v37, %v3074_v23 }
 0x2c5   : > { %4227 = vrot.lane.b32.xlu0 %v7390_v49, %s7007_s2 }
 0x2c6   : > { %v3133_v42 = vmul.f32 1.442695, %v3114_v24 }
 0x2c7   : > { %v3316_v55 = vpop.permute.xlu0 %3315 }
 0x2c8   : > { %6683 = vmatpush3.msra.mxu1 %v3316_v55  ;;  %6904 = vpow2.f32 %v3133_v42 }
 0x2c9   : > { %6692 = vmatprep.subr.mxu1 %v7004_v3  ;;  %6906 = vpow2.f32 %v3129_v27 }
 0x2cb   : > { %v7621_v33 = vpop.permute.xlu0 %3391 }
 0x2cf   : > { %v7623_v36 = vpop.permute.xlu0 %3467 }
 0x2d3   : > { %v7625_v31 = vpop.permute.xlu0 %3543 }
 0x2d5   : > { %v7613_v28 = vpop.eup %6904 }
 0x2d6   : > { %v3168_v62 = vsel %vm3062_vm4, %v7613_v28, 0.0  ;;  %v7617_v32 = vpop.eup %6906 }
 0x2d7   : > { %v3162_v49 = vsel %vm3062_vm4, %v7617_v32, 0.0  ;;  %v7627_v37 = vpop.permute.xlu0 %3619 }
 0x2db   : > { %v7629_v39 = vpop.permute.xlu0 %3695 }
 0x2df   : > { %v7631_v44 = vpop.permute.xlu0 %3771 }
 0x2e3   : > { %v7633_v48 = vpop.permute.xlu0 %3847 }
 0x2e4   : > { %3169 = vadd.xlane.f32.xlu0 %v3168_v62 }
 0x2e8   : > { %3163 = vadd.xlane.f32.xlu0 %v3162_v49 }
 0x2ea   : > { %v3077_v40 = vpop.xlane.xlu1 %3076 }
 0x2eb   : > { %v3115_v59 = vsub.f32 %v7530_v43, %v3077_v40 }
 0x2ed   : > { %v3135_v21 = vmul.f32 1.442695, %v3115_v59 }
 0x2ee   : > { %v3083_v45 = vpop.xlane.xlu1 %3082 }
 0x2ef   : > { %v3117_v1 = vsub.f32 %v7536_v52, %v3083_v45 }
 0x2f2   : > { %v3089_v51 = vpop.xlane.xlu1 %3088 }
 0x2f3   : > { %v3119_v7 = vsub.f32 %v7542_v6, %v3089_v51 }
 0x2f5   : > { %v3143_v9 = vmul.f32 1.442695, %v3119_v7 }
 0x2f6   : > { %v3095_v12 = vpop.xlane.xlu1 %3094 }
 0x2fa   : > { %v3101_v30 = vpop.xlane.xlu1 %3100 }
 0x2fb   : > { %v3123_v17 = vsub.f32 %v7564_v29, %v3101_v30 }
 0x2fe   : > { %v3107_v10 = vpop.xlane.xlu1 %3106 }
 0x2ff   : > { %v3125_v13 = vsub.f32 %v7574_v4, %v3107_v10 }
 0x314   : > { %v3080_v53 = vpop.xlane.xlu0 %3079 }
 0x315   : > { %v3116_v56 = vsub.f32 %v7526_v41, %v3080_v53  ;;  %v3139_v41 = vmul.f32 1.442695, %v3117_v1 }
 0x317   : > { %v3137_v60 = vmul.f32 1.442695, %v3116_v56 }
 0x318   : > { %v3071_v0 = vpop.xlane.xlu0 %3070 }
 0x319   : > { %6908 = vpow2.f32 %v3137_v60  ;;  %v3113_v19 = vsub.f32 %v7520_v35, %v3071_v0  ;;  %v3121_v35 = vsub.f32 %v7552_v61, %v3095_v12 }
 0x31b   : > { %v3131_v25 = vmul.f32 1.442695, %v3113_v19  ;;  %v3147_v6 = vmul.f32 1.442695, %v3121_v35 }
 0x31c   : > { %v3086_v38 = vpop.xlane.xlu0 %3085 }
 0x31d   : > { %6910 = vpow2.f32 %v3131_v25  ;;  %v3118_v5 = vsub.f32 %v7532_v46, %v3086_v38 }
 0x31e   : > { %6912 = vpow2.f32 %v3135_v21 }
 0x31f   : > { %v3141_v43 = vmul.f32 1.442695, %v3118_v5  ;;  %v7700_v5 = vpop.permute.xlu1 %3923 }
 0x320   : > { %v3092_v47 = vpop.xlane.xlu0 %3091 }
 0x321   : > { %6914 = vpow2.f32 %v3141_v43  ;;  %v3120_v8 = vsub.f32 %v7534_v50, %v3092_v47 }
 0x322   : > { %6916 = vpow2.f32 %v3139_v41 }
 0x323   : > { %v3145_v52 = vmul.f32 1.442695, %v3120_v8 }
 0x324   : > { %v3098_v11 = vpop.xlane.xlu0 %3097 }
 0x325   : > { %6918 = vpow2.f32 %v3145_v52  ;;  %v3122_v46 = vsub.f32 %v7538_v54, %v3098_v11  ;;  %v3155_v54 = vmul.f32 1.442695, %v3125_v13 }
 0x326   : > { %v7644_v34 = vpop.eup %6908  ;;  %6920 = vpow2.f32 %v3143_v9 }
 0x327   : > { %v3149_v14 = vmul.f32 1.442695, %v3122_v46  ;;  %v3174_v50 = vsel %vm3062_vm4, %v7644_v34, 0.0 }
 0x328   : > { %3175 = vadd.xlane.f32.xlu0 %v3174_v50  ;;  %v3104_v15 = vpop.xlane.xlu0 %3103 }
 0x329   : > { %6922 = vpow2.f32 %v3149_v14  ;;  %v3124_v61 = vsub.f32 %v7544_v58, %v3104_v15  ;;  %v3151_v58 = vmul.f32 1.442695, %v3123_v17 }
 0x32a   : > { %v7650_v16 = vpop.eup %6910  ;;  %6924 = vpow2.f32 %v3147_v6 }
 0x32b   : > { %v3153_v18 = vmul.f32 1.442695, %v3124_v61  ;;  %v3165_v22 = vsel %vm3062_vm4, %v7650_v16, 0.0  ;;  %v7655_v4 = vpop.eup %6912 }
 0x32c   : > { %v3110_v23 = vpop.xlane.xlu0 %3109  ;;  %3166 = vadd.xlane.f32.xlu1 %v3165_v22  ;;  %v3171_v42 = vsel %vm3062_vm4, %v7655_v4, 0.0 }
 0x32d   : > { %6926 = vpow2.f32 %v3153_v18  ;;  %v3126_v55 = vsub.f32 %v7554_v63, %v3110_v23 }
 0x32e   : > { %v7658_v24 = vpop.eup %6914  ;;  %6928 = vpow2.f32 %v3155_v54 }
 0x32f   : > { %v3157_v26 = vmul.f32 1.442695, %v3126_v55  ;;  %v3180_v29 = vsel %vm3062_vm4, %v7658_v24, 0.0  ;;  %v7664_v27 = vpop.eup %6916 }
 0x330   : > { %3181 = vadd.xlane.f32.xlu0 %v3180_v29  ;;  %3172 = vadd.xlane.f32.xlu1 %v3171_v42  ;;  %v3177_v40 = vsel %vm3062_vm4, %v7664_v27, 0.0  ;;  %v7706_v41 = vpop.permute.xlu0 %3999 }
 0x331   : > { %6930 = vpow2.f32 %v3157_v26 }
 0x332   : > { %v7666_v62 = vpop.eup %6918  ;;  %6932 = vpow2.f32 %v3151_v58 }
 0x333   : > { %v7668_v49 = vpop.eup %6920  ;;  %v3186_v63 = vsel %vm3062_vm4, %v7666_v62, 0.0 }
 0x334   : > { %3187 = vadd.xlane.f32.xlu0 %v3186_v63  ;;  %3178 = vadd.xlane.f32.xlu1 %v3177_v40  ;;  %v3183_v53 = vsel %vm3062_vm4, %v7668_v49, 0.0  ;;  %v7714_v47 = vpop.permute.xlu0 %4075 }
 0x336   : > { %v7674_v45 = vpop.eup %6922 }
 0x337   : > { %v3192_v51 = vsel %vm3062_vm4, %v7674_v45, 0.0  ;;  %v7680_v56 = vpop.eup %6924 }
 0x338   : > { %3193 = vadd.xlane.f32.xlu0 %v3192_v51  ;;  %3184 = vadd.xlane.f32.xlu1 %v3183_v53  ;;  %v3189_v12 = vsel %vm3062_vm4, %v7680_v56, 0.0 }
 0x33a   : > { %v7682_v59 = vpop.eup %6926 }
 0x33b   : > { %v3198_v60 = vsel %vm3062_vm4, %v7682_v59, 0.0  ;;  %v7688_v0 = vpop.eup %6928 }
 0x33c   : > { %3199 = vadd.xlane.f32.xlu0 %v3198_v60  ;;  %3190 = vadd.xlane.f32.xlu1 %v3189_v12  ;;  %v3201_v1 = vsel %vm3062_vm4, %v7688_v0, 0.0  ;;  %v4455_v12 = vld [vmem:[%s7103_s15] sm:$0x3] }
 0x33e   : > { %v7690_v19 = vpop.eup %6930 }
 0x33f   : > { %v3204_v21 = vsel %vm3062_vm4, %v7690_v19, 0.0  ;;  %v7696_v25 = vpop.eup %6932 }
 0x340   : > { %3205 = vadd.xlane.f32.xlu1 %v3204_v21  ;;  %3202 = vadd.xlane.f32.xlu0 %v3201_v1  ;;  %v3195_v38 = vsel %vm3062_vm4, %v7696_v25, 0.0 }
 0x344   : > { %3196 = vadd.xlane.f32.xlu1 %v3195_v38 }
 0x348   : > { %v3161_v7 = vpop.xlane.xlu1 %3160 }
 0x349   : > { %6934 = vrcp.f32 %v3161_v7 }
 0x355   : > { %4303 = vrot.lane.b32.xlu1 %v7412_v2, %s7007_s2  ;;  %v7716_v2 = vpop.permute.xlu0 %4151 }
 0x356   : > { %v6935_v30 = vpop.eup %6934  ;;  %4379 = vrot.lane.b32.xlu0 %v7400_v57, %s7007_s2 }
 0x357   : > { %v3223_v43 = vmul.f32 %v6935_v30, %v7600_v20 }
 0x359   : > { %6680 = vmatmul.mubr.msk.f32.vlgmr.msra.gmra.mxu0 %vm3062_vm4, %v3223_v43  ;;  %v7718_v8 = vpop.permute.xlu0 %4227 }
 0x35a   : > { %6688 = vmatpush3.msra.mxu0 %v7621_v33  ;;  %6689 = vmatprep.mubr.msk.f32.mxu0 %vm7005_vm2, %v7004_v3 }
 0x35b   : > { %6697 = vmatprep.subr.mxu0 %v7004_v3 }
 0x36d   : > { %v3170_v57 = vpop.xlane.xlu0 %3169 }
 0x371   : > { %v3164_v9 = vpop.xlane.xlu0 %3163 }
 0x372   : > { %6936 = vrcp.f32 %v3164_v9  ;;  %v4464_v9 = vld [vmem:[%s7103_s15 + $0x12] sm:$0x3] }
 0x373   : > { %6938 = vrcp.f32 %v3170_v57 }
 0x37f   : > { %v6937_v20 = vpop.eup %6936 }
 0x380   : > { %v3224_v35 = vmul.f32 %v6937_v20, %v7617_v32  ;;  %v6939_v52 = vpop.eup %6938 }
 0x381   : > { %v3226_v33 = vmul.f32 %v6939_v52, %v7613_v28 }
 0x382   : > { %6685 = vmatmul.mubr.msk.f32.vlgmr.msra.gmra.mxu1 %vm3062_vm4, %v3224_v35  ;;  %v4461_v35 = vld [vmem:[%s7103_s15 + $0xc] sm:$0x3] }
 0x383   : > { %6693 = vmatpush3.msra.mxu1 %v7623_v36  ;;  %6694 = vmatprep.mubr.msk.f32.mxu1 %vm7005_vm2, %v7004_v3 }
 0x384   : > { %6702 = vmatprep.subr.mxu1 %v7004_v3 }
 0x386   : > { %6695 = vmatmul.mubr.msk.f32.vlgmr.msra.gmra.mxu1 %vm3062_vm4, %v3226_v33 }
 0x387   : > { %6703 = vmatpush3.msra.mxu1 %v7627_v37  ;;  %6704 = vmatprep.mubr.msk.f32.mxu1 %vm7005_vm2, %v7004_v3 }
 0x388   : > { %6712 = vmatprep.subr.mxu1 %v7004_v3 }
 0x3b1   : > { %v3176_v32 = vpop.xlane.xlu0 %3175 }
 0x3b2   : > { %6940 = vrcp.f32 %v3176_v32 }
 0x3b5   : > { %v3167_v10 = vpop.xlane.xlu1 %3166 }
 0x3b6   : > { %6942 = vrcp.f32 %v3167_v10  ;;  %v4466_v10 = vld [vmem:[%s7103_s15 + $0x16] sm:$0x3] }
 0x3b9   : > { %v3182_v36 = vpop.xlane.xlu0 %3181  ;;  %v3173_v11 = vpop.xlane.xlu1 %3172 }
 0x3ba   : > { %6944 = vrcp.f32 %v3182_v36 }
 0x3bb   : > { %6946 = vrcp.f32 %v3173_v11  ;;  %v4463_v11 = vld [vmem:[%s7103_s15 + $0x10] sm:$0x3] }
 0x3bd   : > { %v3188_v46 = vpop.xlane.xlu0 %3187  ;;  %v3179_v6 = vpop.xlane.xlu1 %3178 }
 0x3be   : > { %6948 = vrcp.f32 %v3188_v46 }
 0x3bf   : > { %v6941_v28 = vpop.eup %6940  ;;  %6950 = vrcp.f32 %v3179_v6 }
 0x3c0   : > { %v3228_v37 = vmul.f32 %v6941_v28, %v7644_v34 }
 0x3c1   : > { %v3194_v13 = vpop.xlane.xlu0 %3193  ;;  %v3185_v14 = vpop.xlane.xlu1 %3184 }
 0x3c2   : > { %6952 = vrcp.f32 %v3194_v13  ;;  %6705 = vmatmul.mubr.msk.f32.vlgmr.msra.gmra.mxu1 %vm3062_vm4, %v3228_v37  ;;  %v4468_v37 = vld [vmem:[%s7103_s15 + $0x1a] sm:$0x3] }
 0x3c3   : > { %v6943_v50 = vpop.eup %6942  ;;  %6954 = vrcp.f32 %v3185_v14  ;;  %6713 = vmatpush3.msra.mxu1 %v7631_v44  ;;  %6714 = vmatprep.mubr.msk.f32.mxu1 %vm7005_vm2, %v7004_v3  ;;  %v4465_v14 = vld [vmem:[%s7103_s15 + $0x14] sm:$0x3] }
 0x3c4   : > { %v3225_v15 = vmul.f32 %v6943_v50, %v7650_v16  ;;  %6722 = vmatprep.subr.mxu1 %v7004_v3 }
 0x3c5   : > { %v3200_v61 = vpop.xlane.xlu0 %3199  ;;  %v3191_v17 = vpop.xlane.xlu1 %3190 }
 0x3c6   : > { %6956 = vrcp.f32 %v3200_v61  ;;  %6690 = vmatmul.mubr.msk.f32.vlgmr.msra.gmra.mxu0 %vm3062_vm4, %v3225_v15 }
 0x3c7   : > { %v6945_v34 = vpop.eup %6944  ;;  %6958 = vrcp.f32 %v3191_v17  ;;  %6698 = vmatpush3.msra.mxu0 %v7625_v31  ;;  %6699 = vmatprep.mubr.msk.f32.mxu0 %vm7005_vm2, %v7004_v3  ;;  %v4470_v17 = vld [vmem:[%s7103_s15 + $0x1e] sm:$0x3] }
 0x3c8   : > { %v6947_v44 = vpop.eup %6946  ;;  %6707 = vmatprep.subr.mxu0 %v7004_v3  ;;  %v3230_v54 = vmul.f32 %v6945_v34, %v7658_v24 }
 0x3c9   : > { %v3206_v16 = vpop.xlane.xlu1 %3205  ;;  %v3227_v18 = vmul.f32 %v6947_v44, %v7655_v4  ;;  %v3203_v55 = vpop.xlane.xlu0 %3202  ;;  %v4467_v44 = vld [vmem:[%s7103_s15 + $0x18] sm:$0x3] }
 0x3ca   : > { %6715 = vmatmul.mubr.msk.f32.vlgmr.msra.gmra.mxu1 %vm3062_vm4, %v3230_v54  ;;  %6960 = vrcp.f32 %v3206_v16 }
 0x3cb   : > { %v6949_v22 = vpop.eup %6948  ;;  %6700 = vmatmul.mubr.msk.f32.vlgmr.msra.gmra.mxu0 %vm3062_vm4, %v3227_v18  ;;  %6723 = vmatpush3.msra.mxu1 %v7700_v5  ;;  %v4460_v5 = vld [vmem:[%s7103_s15 + $0xa] sm:$0x3] }
 0x3cc   : > { %v6951_v31 = vpop.eup %6950  ;;  %6708 = vmatpush3.msra.mxu0 %v7629_v39  ;;  %6724 = vmatprep.mubr.msk.f32.mxu1 %vm7005_vm2, %v7004_v3  ;;  %v3232_v23 = vmul.f32 %v6949_v22, %v7666_v62 }
 0x3cd   : > { %6709 = vmatprep.mubr.msk.f32.mxu0 %vm7005_vm2, %v7004_v3  ;;  %6717 = vmatprep.subr.mxu0 %v7004_v3  ;;  %v3197_v4 = vpop.xlane.xlu1 %3196  ;;  %v3229_v24 = vmul.f32 %v6951_v31, %v7664_v27 }
 0x3ce   : > { %6732 = vmatprep.subr.mxu1 %v7004_v3  ;;  %6962 = vrcp.f32 %v3197_v4  ;;  %6725 = vmatmul.mubr.msk.f32.vlgmr.msra.gmra.mxu1 %vm3062_vm4, %v3232_v23  ;;  %v4469_v23 = vld [vmem:[%s7103_s15 + $0x1c] sm:$0x3] }
 0x3cf   : > { %v6953_v39 = vpop.eup %6952  ;;  %6710 = vmatmul.mubr.msk.f32.vlgmr.msra.gmra.mxu0 %vm3062_vm4, %v3229_v24  ;;  %6733 = vmatpush3.msra.mxu1 %v7714_v47  ;;  %6964 = vrcp.f32 %v3203_v55 }
 0x3d0   : > { %v6955_v58 = vpop.eup %6954  ;;  %6718 = vmatpush3.msra.mxu0 %v7633_v48  ;;  %6719 = vmatprep.mubr.msk.f32.mxu0 %vm7005_vm2, %v7004_v3  ;;  %v3234_v26 = vmul.f32 %v6953_v39, %v7674_v45  ;;  %v4456_v45 = vld [vmem:[%s7103_s15 + $0x2] sm:$0x3] }
 0x3d1   : > { %6727 = vmatprep.subr.mxu0 %v7004_v3  ;;  %6734 = vmatprep.mubr.msk.f32.mxu1 %vm7005_vm2, %v7004_v3  ;;  %v3231_v29 = vmul.f32 %v6955_v58, %v7668_v49  ;;  %v4380_v49 = vpop.permute.xlu0 %4379 }
 0x3d2   : > { %6742 = vmatprep.subr.mxu1 %v7004_v3  ;;  %6735 = vmatmul.mubr.msk.f32.vlgmr.msra.gmra.mxu1 %vm3062_vm4, %v3234_v26 }
 0x3d3   : > { %v6957_v42 = vpop.eup %6956  ;;  %6720 = vmatmul.mubr.msk.f32.vlgmr.msra.gmra.mxu0 %vm3062_vm4, %v3231_v29  ;;  %6743 = vmatpush3.msra.mxu1 %v7718_v8  ;;  %v5731_v29 = vld [vmem:[%s7108_s20 + $0x18] sm:$0xff] }
 0x3d4   : > { %v6959_v48 = vpop.eup %6958  ;;  %6728 = vmatpush3.msra.mxu0 %v7706_v41  ;;  %6729 = vmatprep.mubr.msk.f32.mxu0 %vm7005_vm2, %v7004_v3  ;;  %v3236_v27 = vmul.f32 %v6957_v42, %v7682_v59  ;;  %v4304_v59 = vpop.permute.xlu1 %4303  ;;  %v4462_v41 = vld [vmem:[%s7103_s15 + $0xe] sm:$0x3]  ;;  %v5730_v42 = vld [vmem:[%s7108_s20 + $0x10] sm:$0xff] }
 0x3d5   : > { %6737 = vmatprep.subr.mxu0 %v7004_v3  ;;  %6744 = vmatprep.mubr.msk.f32.mxu1 %vm7005_vm2, %v7004_v3  ;;  %v3233_v62 = vmul.f32 %v6959_v48, %v7680_v56  ;;  %v5729_v48 = vld [vmem:[%s7108_s20 + $0x8] sm:$0xff] }
 0x3d6   : > { %6752 = vmatprep.subr.mxu1 %v7004_v3  ;;  %6745 = vmatmul.mubr.msk.f32.vlgmr.msra.gmra.mxu1 %vm3062_vm4, %v3236_v27  ;;  %v5828_v27 = vld [vmem:[%s7118_s29 + $0x78] sm:$0xff] }
 0x3d7   : > { %6730 = vmatmul.mubr.msk.f32.vlgmr.msra.gmra.mxu0 %vm3062_vm4, %v3233_v62  ;;  %6753 = vmatpush3.msra.mxu1 %v4380_v49  ;;  %v6961_v63 = vpop.eup %6960  ;;  %v5827_v62 = vld [vmem:[%s7118_s29 + $0x70] sm:$0xff]  ;;  %v5728_v49 = vld [vmem:[%s7108_s20] sm:$0xff] }
 0x3d8   : > { %6738 = vmatpush3.msra.mxu0 %v7716_v2  ;;  %6754 = vmatprep.mubr.msk.f32.mxu1 %vm7005_vm2, %v7004_v3  ;;  %v3238_v40 = vmul.f32 %v6961_v63, %v7690_v19  ;;  %v4457_v19 = vld [vmem:[%s7103_s15 + $0x4] sm:$0x3]  ;;  %v4459_v2 = vld [vmem:[%s7103_s15 + $0x8] sm:$0x3] }
 0x3d9   : > { %6739 = vmatprep.mubr.msk.f32.mxu0 %vm7005_vm2, %v7004_v3  ;;  %6747 = vmatprep.subr.mxu0 %v7004_v3  ;;  %v5826_v63 = vld [vmem:[%s7118_s29 + $0x68] sm:$0xff] }
 0x3da   : > { %6762 = vmatprep.subr.mxu1 %v7004_v3  ;;  %6755 = vmatmul.mubr.msk.f32.vlgmr.msra.gmra.mxu1 %vm3062_vm4, %v3238_v40  ;;  %v5825_v40 = vld [vmem:[%s7118_s29 + $0x60] sm:$0xff] }
 0x3db   : > { %v6963_v51 = vpop.eup %6962  ;;  %6763 = vmatpush3.msk.msra.mxu1 %vm4474_vm5, %v4456_v45  ;;  %6764 = vmatprep.mubr.msk.f32.mxu1 %vm7005_vm2, %v7004_v3  ;;  %v5824_v45 = vld [vmem:[%s7118_s29 + $0x58] sm:$0xff] }
 0x3dc   : > { %v3235_v53 = vmul.f32 %v6963_v51, %v7696_v25  ;;  %v6965_v56 = vpop.eup %6964  ;;  %6772 = vmatprep.subr.mxu1 %v7004_v3  ;;  %v5823_v51 = vld [vmem:[%s7118_s29 + $0x50] sm:$0xff] }
 0x3dd   : > { %v3237_v60 = vmul.f32 %v6965_v56, %v7688_v0  ;;  %v4458_v0 = vld [vmem:[%s7103_s15 + $0x6] sm:$0x3] }
 0x3de   : > { %6740 = vmatmul.mubr.msk.f32.vlgmr.msra.gmra.mxu0 %vm3062_vm4, %v3235_v53  ;;  %v5822_v53 = vld [vmem:[%s7118_s29 + $0x48] sm:$0xff]  ;;  %v5821_v56 = vld [vmem:[%s7118_s29 + $0x40] sm:$0xff] }
 0x3df   : > { %6748 = vmatpush3.msra.mxu0 %v4304_v59  ;;  %6749 = vmatprep.mubr.msk.f32.mxu0 %vm7005_vm2, %v7004_v3  ;;  %v5820_v59 = vld [vmem:[%s7118_s29 + $0x38] sm:$0xff] }
 0x3e0   : > { %6757 = vmatprep.subr.mxu0 %v7004_v3 }
 0x3e2   : > { %6750 = vmatmul.mubr.msk.f32.vlgmr.msra.gmra.mxu0 %vm3062_vm4, %v3237_v60  ;;  %v5819_v60 = vld [vmem:[%s7118_s29 + $0x30] sm:$0xff] }
 0x3e3   : > { %6758 = vmatpush3.msk.msra.mxu0 %vm4474_vm5, %v4455_v12  ;;  %6759 = vmatprep.mubr.msk.f32.mxu0 %vm7005_vm2, %v7004_v3  ;;  %v5818_v12 = vld [vmem:[%s7118_s29 + $0x28] sm:$0xff] }
 0x3e4   : > { %6767 = vmatprep.subr.mxu0 %v7004_v3 }
 0x419   : > { %v3311_v21 = vpop.f32.mrf.mxu0 }
 0x41a   : > { %6760 = vmatmul.mubr.msk.f32.vlgmr.msra.gmra.mxu0 %vm1832_vm3, %v3311_v21 }
 0x41b   : > { %v6681_v1 = vpop.f32.mrf.mxu0  ;;  %6768 = vmatpush3.msk.msra.mxu0 %vm4474_vm5, %v4457_v19  ;;  %6769 = vmatprep.mubr.msk.f32.mxu0 %vm7005_vm2, %v7004_v3  ;;  %v5817_v19 = vld [vmem:[%s7118_s29 + $0x20] sm:$0xff] }
 0x41c   : > { %6777 = vmatprep.subr.mxu0 %v7004_v3  ;;  %v5816_v1 = vld [vmem:[%s7118_s29 + $0x18] sm:$0xff] }
 0x442   : > { %v3387_v25 = vpop.f32.mrf.mxu1 }
 0x443   : > { %6765 = vmatmul.mubr.msk.f32.vlgmr.msra.gmra.mxu1 %vm1832_vm3, %v3387_v25 }
 0x444   : > { %v6686_v38 = vpop.f32.mrf.mxu1  ;;  %6773 = vmatpush3.msk.msra.mxu1 %vm4474_vm5, %v4458_v0  ;;  %6774 = vmatprep.mubr.msk.f32.mxu1 %vm7005_vm2, %v7004_v3 }
 0x445   : > { %6782 = vmatprep.subr.mxu1 %v7004_v3 }
 0x446   : > { %v3539_v7 = vpop.f32.mrf.mxu1 }
 0x447   : > { %6775 = vmatmul.mubr.msk.f32.vlgmr.msra.gmra.mxu1 %vm1832_vm3, %v3539_v7 }
 0x448   : > { %v6696_v30 = vpop.f32.mrf.mxu1  ;;  %6783 = vmatpush3.msk.msra.mxu1 %vm4474_vm5, %v4460_v5  ;;  %6784 = vmatprep.mubr.msk.f32.mxu1 %vm7005_vm2, %v7004_v3 }
 0x449   : > { %6792 = vmatprep.subr.mxu1 %v7004_v3 }
 0x482   : > { %v3691_v43 = vpop.f32.mrf.mxu1 }
 0x483   : > { %6785 = vmatmul.mubr.msk.f32.vlgmr.msra.gmra.mxu1 %vm1832_vm3, %v3691_v43 }
 0x484   : > { %v6706_v47 = vpop.f32.mrf.mxu1  ;;  %6793 = vmatpush3.msk.msra.mxu1 %vm4474_vm5, %v4462_v41  ;;  %6794 = vmatprep.mubr.msk.f32.mxu1 %vm7005_vm2, %v7004_v3 }
 0x485   : > { %6802 = vmatprep.subr.mxu1 %v7004_v3 }
 0x486   : > { %v3463_v8 = vpop.f32.mrf.mxu0 }
 0x487   : > { %6770 = vmatmul.mubr.msk.f32.vlgmr.msra.gmra.mxu0 %vm1832_vm3, %v3463_v8 }
 0x488   : > { %v6691_v57 = vpop.f32.mrf.mxu0  ;;  %6778 = vmatpush3.msk.msra.mxu0 %vm4474_vm5, %v4459_v2  ;;  %6779 = vmatprep.mubr.msk.f32.mxu0 %vm7005_vm2, %v7004_v3 }
 0x489   : > { %6787 = vmatprep.subr.mxu0 %v7004_v3 }
 0x48a   : > { %v3843_v20 = vpop.f32.mrf.mxu1 }
 0x48b   : > { %v3615_v52 = vpop.f32.mrf.mxu0  ;;  %6795 = vmatmul.mubr.msk.f32.vlgmr.msra.gmra.mxu1 %vm1832_vm3, %v3843_v20 }
 0x48c   : > { %6780 = vmatmul.mubr.msk.f32.vlgmr.msra.gmra.mxu0 %vm1832_vm3, %v3615_v52  ;;  %v6716_v33 = vpop.f32.mrf.mxu1  ;;  %6803 = vmatpush3.msk.msra.mxu1 %vm4474_vm5, %v4464_v9 }
 0x48d   : > { %v6701_v32 = vpop.f32.mrf.mxu0  ;;  %6788 = vmatpush3.msk.msra.mxu0 %vm4474_vm5, %v4461_v35  ;;  %6789 = vmatprep.mubr.msk.f32.mxu0 %vm7005_vm2, %v7004_v3 }
 0x48e   : > { %v3995_v36 = vpop.f32.mrf.mxu1  ;;  %6804 = vmatprep.mubr.msk.f32.mxu1 %vm7005_vm2, %v7004_v3  ;;  %6797 = vmatprep.subr.mxu0 %v7004_v3 }
 0x48f   : > { %v3767_v46 = vpop.f32.mrf.mxu0  ;;  %6805 = vmatmul.mubr.msk.f32.vlgmr.msra.gmra.mxu1 %vm1832_vm3, %v3995_v36  ;;  %6812 = vmatprep.subr.mxu1 %v7004_v3 }
 0x490   : > { %6790 = vmatmul.mubr.msk.f32.vlgmr.msra.gmra.mxu0 %vm1832_vm3, %v3767_v46  ;;  %v6726_v6 = vpop.f32.mrf.mxu1  ;;  %6813 = vmatpush3.msk.msra.mxu1 %vm4474_vm5, %v4466_v10 }
 0x491   : > { %v6711_v28 = vpop.f32.mrf.mxu0  ;;  %6798 = vmatpush3.msk.msra.mxu0 %vm4474_vm5, %v4463_v11  ;;  %6799 = vmatprep.mubr.msk.f32.mxu0 %vm7005_vm2, %v7004_v3 }
 0x492   : > { %v4147_v13 = vpop.f32.mrf.mxu1  ;;  %6814 = vmatprep.mubr.msk.f32.mxu1 %vm7005_vm2, %v7004_v3  ;;  %6807 = vmatprep.subr.mxu0 %v7004_v3 }
 0x493   : > { %v3919_v50 = vpop.f32.mrf.mxu0  ;;  %6815 = vmatmul.mubr.msk.f32.vlgmr.msra.gmra.mxu1 %vm1832_vm3, %v4147_v13  ;;  %6822 = vmatprep.subr.mxu1 %v7004_v3 }
 0x494   : > { %6800 = vmatmul.mubr.msk.f32.vlgmr.msra.gmra.mxu0 %vm1832_vm3, %v3919_v50  ;;  %v6736_v15 = vpop.f32.mrf.mxu1  ;;  %6823 = vmatpush3.msk.msra.mxu1 %vm4474_vm5, %v4468_v37 }
 0x495   : > { %v6721_v61 = vpop.f32.mrf.mxu0  ;;  %6808 = vmatpush3.msk.msra.mxu0 %vm4474_vm5, %v4465_v14  ;;  %6809 = vmatprep.mubr.msk.f32.mxu0 %vm7005_vm2, %v7004_v3 }
 0x496   : > { %v4299_v34 = vpop.f32.mrf.mxu1  ;;  %6824 = vmatprep.mubr.msk.f32.mxu1 %vm7005_vm2, %v7004_v3  ;;  %6832 = vmatprep.subr.mxu1 %v7004_v3 }
 0x497   : > { %v4071_v54 = vpop.f32.mrf.mxu0  ;;  %6825 = vmatmul.mubr.msk.f32.vlgmr.msra.gmra.mxu1 %vm1832_vm3, %v4299_v34  ;;  %6817 = vmatprep.subr.mxu0 %v7004_v3 }
 0x498   : > { %6810 = vmatmul.mubr.msk.f32.vlgmr.msra.gmra.mxu0 %vm1832_vm3, %v4071_v54  ;;  %v6746_v16 = vpop.f32.mrf.mxu1  ;;  %6833 = vmatpush3.msk.msra.mxu1 %vm4474_vm5, %v4470_v17 }
 0x499   : > { %v6731_v18 = vpop.f32.mrf.mxu0  ;;  %6834 = vmatprep.mubr.msk.f32.mxu1 %vm7005_vm2, %v7004_v3  ;;  %6818 = vmatpush3.msk.msra.mxu0 %vm4474_vm5, %v4467_v44 }
 0x49a   : > { %6819 = vmatprep.mubr.msk.f32.mxu0 %vm7005_vm2, %v7004_v3  ;;  %6827 = vmatprep.subr.mxu0 %v7004_v3  ;;  %v4451_v22 = vpop.f32.mrf.mxu1 }
 0x49b   : > { %6848 = vmatprep.subr.mxu1 %v7004_v3  ;;  %6835 = vmatmul.mubr.msk.f32.vlgmr.msra.gmra.mxu1 %vm1832_vm3, %v4451_v22 }
 0x49c   : > { %v6756_v31 = vpop.f32.mrf.mxu1  ;;  %6880 = vmatprep.mubr.msk.f32.mxu1 %vm7005_vm2, %v7004_v3  ;;  %6849 = vmatpush3.msra.mxu1 %v5828_v27 }
 0x49d   : > { %6850 = vmatprep.subr.mxu1 %v7004_v3 }
 0x49e   : > { %v4223_v55 = vpop.f32.mrf.mxu0  ;;  %6851 = vmatpush3.msra.mxu1 %v5827_v62 }
 0x49f   : > { %6820 = vmatmul.mubr.msk.f32.vlgmr.msra.gmra.mxu0 %vm1832_vm3, %v4223_v55  ;;  %6852 = vmatprep.subr.mxu1 %v7004_v3 }
 0x4a0   : > { %v6741_v4 = vpop.f32.mrf.mxu0  ;;  %6828 = vmatpush3.msk.msra.mxu0 %vm4474_vm5, %v4469_v23  ;;  %6829 = vmatprep.mubr.msk.f32.mxu0 %vm7005_vm2, %v7004_v3 }
 0x4a1   : > { %6837 = vmatprep.subr.mxu0 %v7004_v3  ;;  %6853 = vmatpush3.msra.mxu1 %v5826_v63 }
 0x4a2   : > { %v4375_v24 = vpop.f32.mrf.mxu0  ;;  %6854 = vmatprep.subr.mxu1 %v7004_v3 }
 0x4a3   : > { %6830 = vmatmul.mubr.msk.f32.vlgmr.msra.gmra.mxu0 %vm1832_vm3, %v4375_v24  ;;  %6855 = vmatpush3.msra.mxu1 %v5825_v40 }
 0x4a4   : > { %v6751_v39 = vpop.f32.mrf.mxu0  ;;  %6845 = vmatprep.mubr.msk.f32.mxu0 %vm7005_vm2, %v7004_v3  ;;  %6838 = vmatpush3.msra.mxu0 %v5731_v29 }
 0x4a5   : > { %6839 = vmatprep.subr.mxu0 %v7004_v3  ;;  %6856 = vmatprep.subr.mxu1 %v7004_v3 }
 0x4a6   : > { %6840 = vmatpush3.msra.mxu0 %v5730_v42  ;;  %6857 = vmatpush3.msra.mxu1 %v5824_v45 }
 0x4a7   : > { %6841 = vmatprep.subr.mxu0 %v7004_v3  ;;  %6858 = vmatprep.subr.mxu1 %v7004_v3 }
 0x4a8   : > { %6842 = vmatpush3.msra.mxu0 %v5729_v48  ;;  %6859 = vmatpush3.msra.mxu1 %v5823_v51 }
 0x4a9   : > { %6843 = vmatprep.subr.mxu0 %v7004_v3  ;;  %6860 = vmatprep.subr.mxu1 %v7004_v3 }
 0x4aa   : > { %6844 = vmatpush3.msra.mxu0 %v5728_v49  ;;  %6861 = vmatpush3.msra.mxu1 %v5822_v53 }
 0x4ab   : > { %6862 = vmatprep.subr.mxu1 %v7004_v3 }
 0x4ac   : > { %6863 = vmatpush3.msra.mxu1 %v5821_v56 }
 0x4ad   : > { %6864 = vmatprep.subr.mxu1 %v7004_v3 }
 0x4ae   : > { %6865 = vmatpush3.msra.mxu1 %v5820_v59 }
 0x4af   : > { %6866 = vmatprep.subr.mxu1 %v7004_v3 }
 0x4b0   : > { %6867 = vmatpush3.msra.mxu1 %v5819_v60 }
 0x4b1   : > { %6868 = vmatprep.subr.mxu1 %v7004_v3 }
 0x4b2   : > { %6869 = vmatpush3.msra.mxu1 %v5818_v12  ;;  %v6208_v12 = vld [vmem:[%s8023_s12] ss:$0 sm:$0xff] }
 0x4b3   : > { %6870 = vmatprep.subr.mxu1 %v7004_v3 }
 0x4b4   : > { %6871 = vmatpush3.msra.mxu1 %v5817_v19 }
 0x4b5   : > { %6872 = vmatprep.subr.mxu1 %v7004_v3 }
 0x4b6   : > { %6873 = vmatpush3.msra.mxu1 %v5816_v1 }
 0x4b7   : > { %6874 = vmatprep.subr.mxu1 %v7004_v3 }
 0x4da   : > { %v4544_v58 = vpop.f32.mrf.mxu0 }
 0x4db   : > { %v5688_v0 = vsel %vm705_vm1, %v4544_v58, 0.0 }
 0x4dc   : > { %v6761_v26 = vpop.f32.mrf.mxu0 }
 0x503   : > { %v4620_v21 = vpop.f32.mrf.mxu1 }
 0x504   : > { %v5689_v25 = vsel %vm705_vm1, %v4620_v21, 0.0  ;;  %v527_v21 = vld [vmem:[%s8003_s0] sm:$0xff] }
 0x505   : > { %v5690_v38 = vadd.f32 %v5689_v25, %v5688_v0  ;;  %v6766_v5 = vpop.f32.mrf.mxu1  ;;  %v5815_v25 = vld [vmem:[%s7118_s29 + $0x10] sm:$0xff] }
 0x506   : > { %6875 = vmatpush3.msra.mxu1 %v5815_v25  ;;  %v5813_v5 = vld [vmem:[%s7118_s29] sm:$0xff] }
 0x507   : > { %v4772_v7 = vpop.f32.mrf.mxu1  ;;  %6876 = vmatprep.subr.mxu1 %v7004_v3 }
 0x508   : > { %v5693_v9 = vsel %vm705_vm1, %v4772_v7, 0.0  ;;  %v6209_v7 = vld [vmem:[%s505_s21] ss:$0 sm:$0xff] }
 0x509   : > { %v6776_v30 = vpop.f32.mrf.mxu1 }
 0x543   : > { %v4924_v41 = vpop.f32.mrf.mxu1 }
 0x544   : > { %v5697_v11 = vsel %vm705_vm1, %v4924_v41, 0.0 }
 0x545   : > { %v6786_v43 = vpop.f32.mrf.mxu1 }
 0x547   : > { %v4696_v47 = vpop.f32.mrf.mxu0 }
 0x548   : > { %v5691_v2 = vsel %vm705_vm1, %v4696_v47, 0.0 }
 0x549   : > { %v5692_v8 = vadd.f32 %v5691_v2, %v5690_v38  ;;  %v6771_v57 = vpop.f32.mrf.mxu0  ;;  %v5814_v38 = vld [vmem:[%s7118_s29 + $0x8] sm:$0xff]  ;;  %v6211_v2 = vld [vmem:[%s513_s13] ss:$0 sm:$0xff] }
 0x54a   : > { %6877 = vmatpush3.msra.mxu1 %v5814_v38 }
 0x54b   : > { %v5694_v20 = vadd.f32 %v5693_v9, %v5692_v8  ;;  %v5076_v35 = vpop.f32.mrf.mxu1  ;;  %6878 = vmatprep.subr.mxu1 %v7004_v3 }
 0x54c   : > { %v4848_v52 = vpop.f32.mrf.mxu0  ;;  %v5701_v15 = vsel %vm705_vm1, %v5076_v35, 0.0  ;;  %6879 = vmatpush3.msra.mxu1 %v5813_v5 }
 0x54d   : > { %v5695_v33 = vsel %vm705_vm1, %v4848_v52, 0.0  ;;  %v6796_v32 = vpop.f32.mrf.mxu1 }
 0x54e   : > { %v5696_v10 = vadd.f32 %v5695_v33, %v5694_v20  ;;  %v6781_v36 = vpop.f32.mrf.mxu0 }
 0x54f   : > { %v5228_v46 = vpop.f32.mrf.mxu1 }
 0x550   : > { %v5000_v6 = vpop.f32.mrf.mxu0  ;;  %v5698_v28 = vadd.f32 %v5697_v11, %v5696_v10  ;;  %v5705_v22 = vsel %vm705_vm1, %v5228_v46, 0.0 }
 0x551   : > { %v5699_v37 = vsel %vm705_vm1, %v5000_v6, 0.0  ;;  %v6806_v13 = vpop.f32.mrf.mxu1 }
 0x552   : > { %v5700_v14 = vadd.f32 %v5699_v37, %v5698_v28  ;;  %v6791_v50 = vpop.f32.mrf.mxu0  ;;  %v6212_v28 = vld [vmem:[%s516_s17] ss:$0 sm:$0xff] }
 0x553   : > { %v5380_v61 = vpop.f32.mrf.mxu1  ;;  %v6213_v13 = vld [vmem:[%s519_s3] ss:$0 sm:$0xff] }
 0x554   : > { %v5152_v17 = vpop.f32.mrf.mxu0  ;;  %v5702_v34 = vadd.f32 %v5701_v15, %v5700_v14  ;;  %v5709_v29 = vsel %vm705_vm1, %v5380_v61, 0.0 }
 0x555   : > { %v5703_v44 = vsel %vm705_vm1, %v5152_v17, 0.0  ;;  %v6816_v54 = vpop.f32.mrf.mxu1 }
 0x556   : > { %v5704_v16 = vadd.f32 %v5703_v44, %v5702_v34  ;;  %v6801_v18 = vpop.f32.mrf.mxu0 }
 0x557   : > { %v5532_v31 = vpop.f32.mrf.mxu1 }
 0x558   : > { %v5304_v23 = vpop.f32.mrf.mxu0  ;;  %v5706_v55 = vadd.f32 %v5705_v22, %v5704_v16  ;;  %v5713_v40 = vsel %vm705_vm1, %v5532_v31, 0.0 }
 0x559   : > { %v5707_v4 = vsel %vm705_vm1, %v5304_v23, 0.0  ;;  %v6826_v24 = vpop.f32.mrf.mxu1 }
 0x55a   : > { %v6811_v39 = vpop.f32.mrf.mxu0  ;;  %v5708_v58 = vadd.f32 %v5707_v4, %v5706_v55 }
 0x55b   : > { %v5684_v26 = vpop.f32.mrf.mxu1 }
 0x55c   : > { %v5710_v27 = vadd.f32 %v5709_v29, %v5708_v58  ;;  %v5717_v60 = vsel %vm705_vm1, %v5684_v26, 0.0 }
 0x55d   : > { %v6836_v42 = vpop.f32.mrf.mxu1 }
 0x55f   : > { %v5456_v48 = vpop.f32.mrf.mxu0 }
 0x560   : > { %v5711_v62 = vsel %vm705_vm1, %v5456_v48, 0.0 }
 0x561   : > { %v5712_v49 = vadd.f32 %v5711_v62, %v5710_v27  ;;  %v6821_v63 = vpop.f32.mrf.mxu0 }
 0x563   : > { %v5608_v45 = vpop.f32.mrf.mxu0  ;;  %v5714_v51 = vadd.f32 %v5713_v40, %v5712_v49 }
 0x564   : > { %v5715_v53 = vsel %vm705_vm1, %v5608_v45, 0.0 }
 0x565   : > { %v5716_v56 = vadd.f32 %v5715_v53, %v5714_v51  ;;  %v6831_v59 = vpop.f32.mrf.mxu0 }
 0x567   : > { %v5718_v19 = vadd.f32 %v5717_v60, %v5716_v56 }
 0x569   : > { %v5726_v1 = vadd.f32 %v6208_v12, %v5718_v19 }
 0x56b   : > { %v5727_v0 = vadd.f32 %v5726_v1, %v527_v21 }
 0x56d   : > { %6846 = vmatmul.mubr.msk.f32.vlgmr.msra.gmra.mxu0 %vm705_vm1, %v5727_v0 }
 0x62d   : > { %v5808_v30 = vpop.f32.mrf.mxu0 }
 0x62e   : > { %v5809_v41 = vadd.f32 %v6209_v7, %v5808_v30 }
 0x62f   : > { %v6847_v43 = vpop.f32.mrf.mxu0 }
 0x630   : > { %v5812_v47 = vmax.f32 %v5809_v41, 0.0 }
 0x632   : > { %6881 = vmatmul.mubr.f32.vlgmr.msra.gmra.mxu1 %v5812_v47 }
 0x6f2   : > { %v5902_v8 = vpop.f32.mrf.mxu1 }
 0x6f3   : > { %v5903_v57 = vadd.f32 %v6211_v2, %v5902_v8 }
 0x6f4   : > { %v6882_v3 = vpop.f32.mrf.mxu1 }
 0x6f5   : > { %v5906_v9 = vadd.f32 %v5903_v57, %v527_v21 }
 0x6f7   : > { %v5907_v20 = vsel %vm705_vm1, %v5906_v9, 0.0 }
 0x6f8   : > { %5908 = vadd.xlane.f32.xlu1 %v5907_v20 }
 0x781   : > { %v5909_v35 = vpop.xlane.xlu1 %5908 }
 0x782   : > { %v5911_v52 = vmul.f32 0.03125, %v5909_v35 }
 0x784   : > { %v5912_v33 = vsub.f32 %v5906_v9, %v5911_v52 }
 0x786   : > { %v5913_v32 = vmul.f32 %v5912_v33, %v5912_v33 }
 0x788   : > { %v5914_v10 = vsel %vm705_vm1, %v5913_v32, 0.0 }
 0x789   : > { %5915 = vadd.xlane.f32.xlu0 %v5914_v10 }
 0x812   : > { %v5916_v36 = vpop.xlane.xlu0 %5915 }
 0x813   : > { %v5917_v11 = vmul.f32 0.03125, %v5916_v36 }
 0x815   : > { %v5918_v46 = vadd.f32 1e-05, %v5917_v11 }
 0x817   : > { %6966 = vrsqrt.f32 %v5918_v46 }
 0x824   : > { %v6967_v6 = vpop.eup %6966 }
 0x825   : > { %v5920_v37 = vmul.f32 %v6967_v6, %v5912_v33 }
 0x827   : > { %v5928_v14 = vmul.f32 %v6212_v28, %v5920_v37  ;;  %5941 = sbr.rel (%p6214_p5) target bundleno = 2093 (0x82d), region = 72 }
 0x829   : > { %v5936_v50 = vadd.f32 %v6213_v13, %v5928_v14 }
 0x82b   : > { %5937 = vst.msk [vmem:[#allocation2] sm:$0xff] %vm705_vm1, %v5936_v50 }
 0x82c   : > { %5942 = vst.msk [vmem:[#allocation3] sm:$0xff] %vm705_vm1, %v5936_v50 }
 0x82d PF: > { %p6887_p6 = scmp.eq.s32.totalorder %s7075_s18, 1  ;;  %s7008_s17 = smov [#allocation3]  }
 0x82e   : > { %s5950_s16 = sshll.u32 %s7008_s17, 4  ;;  %s5951_s16 = int_to_ptr.vmem [resolvable:$true] %s5950_s16 }
 0x82f   : > { %s6968_s22 = scalar_lea.vmem %s5951_s16, 128  ;;  %p6975_p10 = scmp.lt.s32.totalorder %s5951_s16, %s5951_s16 }
 0x830   : > { %p6969_p7 = scmp.ne.s32.totalorder %s5951_s16, %s6968_s22  ;;  %p6976_p11 = scmp.lt.s32.totalorder %s6968_s22, %s6968_s22 }
 0x832   : > { %p6970_p8 = pnand %p6969_p7, %p6887_p6  ;;  %p6977_p12 = por %p6976_p11, %p6975_p10 }
 0x834   : > { %p6971_p9 = pneg %p6970_p8 }
 0x836   : > { %p6978_p13 = pnand %p6977_p12, %p6971_p9 }
 0x838   : > { %6981 = shalt.err (!%p6978_p13)
}
 0x839   : > { %6884 = dma.vmem_to_hbm [thread:$0]  (%p6887_p6), %s5951_s16, 128, %s8014_s11, [#allocation4]  }
 0x83a   : > { %6997 = dma.done.wait (%p6887_p6), [#allocation4], 128  }
 0x83b   : > { %6999 = vsyncadd (%p6887_p6), [#allocation4], 4294967168 }
 0x83c PF: > { %s8024_s23 = sld [smem:[#allocation6_spill]] }
 0x842   : > { %s22_s17 = sadd.s32 1, %s8024_s23  }
 0x843   : > { %p19_p0 = scmp.ge.s32.totalorder %s22_s17, 4  }
 0x845   :  { %21 = sbr.rel (!%p19_p0) target bundleno = 5 (0x5), region = 126 }
 0x84a   :  { %5963 = vsyncpa [#allocation4], 1 }
 0x84b   :  { %5965 = vsyncpa [#allocation4 + $0x1], 1 }

</bundles_post_ra>
